<compile_context>
chip_gen: v6e
topology: v6e:2x2x1
jax: 0.10.0
libtpu: 0.0.40
codegen_flags: <defaults>
</compile_context>

<pallas_src>
import jax
import jax.numpy as jnp
from jax.experimental import pallas as pl
from jax.experimental.pallas import tpu as pltpu

C = 2048              # channels fixed by the module
L = 49                # spatial positions fixed by the module (7x7)
K = 4                 # top-k
LANES = 128           # TPU lane width
CGROUPS = C // LANES  # 16 channel groups of 128 lanes each


def _sort4_desc(v0, v1, v2, v3):
    """5-comparator sorting network, descending: t1 >= t2 >= t3 >= t4."""
    a = jnp.maximum(v0, v1); b = jnp.minimum(v0, v1)
    c = jnp.maximum(v2, v3); d = jnp.minimum(v2, v3)
    t1 = jnp.maximum(a, c);  m = jnp.minimum(a, c)
    mm = jnp.maximum(b, d);  t4 = jnp.minimum(b, d)
    t2 = jnp.maximum(m, mm); t3 = jnp.minimum(m, mm)
    return t1, t2, t3, t4


def _insert(ts, v):
    """Insert v into the sorted-descending 4-list ts, drop the smallest (7 ops)."""
    t1, t2, t3, t4 = ts
    m1 = jnp.maximum(t1, v);  c1 = jnp.minimum(t1, v)
    m2 = jnp.maximum(t2, c1); c2 = jnp.minimum(t2, c1)
    m3 = jnp.maximum(t3, c2); c3 = jnp.minimum(t3, c2)
    m4 = jnp.maximum(t4, c3)
    return (m1, m2, m3, m4)


def _topk_mean_kernel(x_ref, o_ref):
    # x_ref: (Bt, L, CGROUPS, 128) -- Bt batch elements, channel-minor
    # o_ref: (Bt, CGROUPS, 128)    -- lane-dense top-4 mean per channel
    def sl(j):
        return x_ref[:, j]          # (Bt, CGROUPS, 128), native dtype

    even = list(range(0, L, 2))     # 25 positions -> stream A
    odd = list(range(1, L, 2))      # 24 positions -> stream B

    # Two independent sorted-top-4 streams for ILP on the VALU.
    ta = _sort4_desc(sl(even[0]), sl(even[1]), sl(even[2]), sl(even[3]))
    tb = _sort4_desc(sl(odd[0]), sl(odd[1]), sl(odd[2]), sl(odd[3]))

    rest_a = even[4:]
    rest_b = odd[4:]
    for i in range(max(len(rest_a), len(rest_b))):
        if i < len(rest_a):
            ta = _insert(ta, sl(rest_a[i]))
        if i < len(rest_b):
            tb = _insert(tb, sl(rest_b[i]))

    # Merge the two sorted-4 lists exactly: a descending list followed by a
    # reversed descending list is bitonic, so one half-cleaner (4 maxima)
    # yields exactly the multiset of the 4 largest of the union.
    a1, a2, a3, a4 = (t.astype(jnp.float32) for t in ta)
    b1, b2, b3, b4 = (t.astype(jnp.float32) for t in tb)
    s = (jnp.maximum(a1, b4) + jnp.maximum(a2, b3)
         + jnp.maximum(a3, b2) + jnp.maximum(a4, b1))

    o_ref[...] = (s * (1.0 / K)).astype(o_ref.dtype)


def _pick_bt(b):
    """Largest Bt in {8,4,2} dividing b that still leaves >=2 grid steps."""
    for bt in (8, 4, 2):
        if b % bt == 0 and b // bt >= 2:
            return bt
    return 1


def apool_forward(x, dim=None):
    """Pallas equivalent of apool.forward(input, dim). `dim` is unused (as in torch)."""
    feat = x.reshape(-1, C, L)                       # (B, 2048, 49)
    b = feat.shape[0]

    # Channel-minor relayout so channels land on (sublane, lane):
    # (B, 2048, 49) -> (B, 49, 2048) -> (B, 49, 16, 128)
    # TODO(synk): this transpose is an extra HBM round trip; in the full net the
    # producing layer should emit channel-minor activations (or XLA must fuse
    # this transpose into the producer) so the kernel reads HBM exactly once.
    lanes = feat.transpose(0, 2, 1).reshape(b, L, CGROUPS, LANES)

    bt = _pick_bt(b)
    grid = (b // bt,)
    itemsize = jnp.dtype(x.dtype).itemsize

    out = pl.pallas_call(
        _topk_mean_kernel,
        out_shape=jax.ShapeDtypeStruct((b, CGROUPS, LANES), x.dtype),
        grid_spec=pltpu.PrefetchScalarGridSpec(
            num_scalar_prefetch=0,
            grid=grid,
            in_specs=[pl.BlockSpec((bt, L, CGROUPS, LANES),
                                   lambda i: (i, 0, 0, 0))],
            out_specs=pl.BlockSpec((bt, CGROUPS, LANES),
                                   lambda i: (i, 0, 0)),
        ),
        compiler_params=pltpu.CompilerParams(
            dimension_semantics=("parallel",)),
        cost_estimate=pl.CostEstimate(
            flops=b * C * (L * 7 + 28),
            transcendentals=0,
            bytes_accessed=b * C * L * itemsize + b * C * itemsize),
    )(lanes)

    # (B, 16, 128) -> (B, 2048) restores the original channel order, then the
    # two trailing singleton dims of the torch module.
    return out.reshape(b, C, 1, 1)


def _reference(x):
    feat = x.reshape(-1, C, L)
    a = jnp.sort(feat, axis=2)[:, :, ::-1][:, :, :K]
    return (a.sum(axis=2) / K)[:, :, None, None]


if __name__ == "__main__":
    key = jax.random.PRNGKey(0)
    # Smallest shape consistent with the hard-coded reshape(-1, 2048, 49):
    # batch=2, 7x7 spatial map (grid = 2 parallel steps -> both v7x TCs used).
    x = jax.random.normal(key, (2, C, 7, 7), dtype=jnp.float32)

    out = apool_forward(x, dim=2)
    out = jax.block_until_ready(out)

    ref = _reference(x)
    assert out.shape == (2, C, 1, 1)
    assert jnp.allclose(out, ref, atol=1e-5, rtol=1e-5)
    print("KERNEL_OK")
</pallas_src>

<mosaic_0001>
module attributes {stable_mosaic.version = 11 : i64} {
  func.func @_topk_mean_kernel(%arg0: i32, %arg1: memref<1x49x16x128xf32, #tpu.memory_space<vmem>>, %arg2: memref<1x16x128xf32, #tpu.memory_space<vmem>>) attributes {dimension_semantics = [#tpu.dimension_semantics<parallel>], iteration_bounds = array<i64: 2>, scalar_prefetch = 0 : i64, scratch_operands = 0 : i64, tpu.core_type = #tpu.core_type<tc>, window_params = [{transform_indices = @transform_0, window_bounds = array<i64: 1, 49, 16, 128>}, {transform_indices = @transform_1, window_bounds = array<i64: 1, 16, 128>}]} {
    %c0 = arith.constant 0 : index
    %c0_0 = arith.constant 0 : index
    %c0_1 = arith.constant 0 : index
    %c0_2 = arith.constant 0 : index
    %0 = vector.load %arg1[%c0, %c0_0, %c0_1, %c0_2] : memref<1x49x16x128xf32, #tpu.memory_space<vmem>>, vector<1x1x16x128xf32>
    %1 = vector.shape_cast %0 : vector<1x1x16x128xf32> to vector<1x16x128xf32>
    %c0_3 = arith.constant 0 : index
    %c2 = arith.constant 2 : index
    %c0_4 = arith.constant 0 : index
    %c0_5 = arith.constant 0 : index
    %2 = vector.load %arg1[%c0_3, %c2, %c0_4, %c0_5] : memref<1x49x16x128xf32, #tpu.memory_space<vmem>>, vector<1x1x16x128xf32>
    %3 = vector.shape_cast %2 : vector<1x1x16x128xf32> to vector<1x16x128xf32>
    %c0_6 = arith.constant 0 : index
    %c4 = arith.constant 4 : index
    %c0_7 = arith.constant 0 : index
    %c0_8 = arith.constant 0 : index
    %4 = vector.load %arg1[%c0_6, %c4, %c0_7, %c0_8] : memref<1x49x16x128xf32, #tpu.memory_space<vmem>>, vector<1x1x16x128xf32>
    %5 = vector.shape_cast %4 : vector<1x1x16x128xf32> to vector<1x16x128xf32>
    %c0_9 = arith.constant 0 : index
    %c6 = arith.constant 6 : index
    %c0_10 = arith.constant 0 : index
    %c0_11 = arith.constant 0 : index
    %6 = vector.load %arg1[%c0_9, %c6, %c0_10, %c0_11] : memref<1x49x16x128xf32, #tpu.memory_space<vmem>>, vector<1x1x16x128xf32>
    %7 = vector.shape_cast %6 : vector<1x1x16x128xf32> to vector<1x16x128xf32>
    %8 = arith.maximumf %1, %3 : vector<1x16x128xf32>
    %9 = arith.minimumf %1, %3 : vector<1x16x128xf32>
    %10 = arith.maximumf %5, %7 : vector<1x16x128xf32>
    %11 = arith.minimumf %5, %7 : vector<1x16x128xf32>
    %12 = arith.maximumf %8, %10 : vector<1x16x128xf32>
    %13 = arith.minimumf %8, %10 : vector<1x16x128xf32>
    %14 = arith.maximumf %9, %11 : vector<1x16x128xf32>
    %15 = arith.minimumf %9, %11 : vector<1x16x128xf32>
    %16 = arith.maximumf %13, %14 : vector<1x16x128xf32>
    %17 = arith.minimumf %13, %14 : vector<1x16x128xf32>
    %c0_12 = arith.constant 0 : index
    %c1 = arith.constant 1 : index
    %c0_13 = arith.constant 0 : index
    %c0_14 = arith.constant 0 : index
    %18 = vector.load %arg1[%c0_12, %c1, %c0_13, %c0_14] : memref<1x49x16x128xf32, #tpu.memory_space<vmem>>, vector<1x1x16x128xf32>
    %19 = vector.shape_cast %18 : vector<1x1x16x128xf32> to vector<1x16x128xf32>
    %c0_15 = arith.constant 0 : index
    %c3 = arith.constant 3 : index
    %c0_16 = arith.constant 0 : index
    %c0_17 = arith.constant 0 : index
    %20 = vector.load %arg1[%c0_15, %c3, %c0_16, %c0_17] : memref<1x49x16x128xf32, #tpu.memory_space<vmem>>, vector<1x1x16x128xf32>
    %21 = vector.shape_cast %20 : vector<1x1x16x128xf32> to vector<1x16x128xf32>
    %c0_18 = arith.constant 0 : index
    %c5 = arith.constant 5 : index
    %c0_19 = arith.constant 0 : index
    %c0_20 = arith.constant 0 : index
    %22 = vector.load %arg1[%c0_18, %c5, %c0_19, %c0_20] : memref<1x49x16x128xf32, #tpu.memory_space<vmem>>, vector<1x1x16x128xf32>
    %23 = vector.shape_cast %22 : vector<1x1x16x128xf32> to vector<1x16x128xf32>
    %c0_21 = arith.constant 0 : index
    %c7 = arith.constant 7 : index
    %c0_22 = arith.constant 0 : index
    %c0_23 = arith.constant 0 : index
    %24 = vector.load %arg1[%c0_21, %c7, %c0_22, %c0_23] : memref<1x49x16x128xf32, #tpu.memory_space<vmem>>, vector<1x1x16x128xf32>
    %25 = vector.shape_cast %24 : vector<1x1x16x128xf32> to vector<1x16x128xf32>
    %26 = arith.maximumf %19, %21 : vector<1x16x128xf32>
    %27 = arith.minimumf %19, %21 : vector<1x16x128xf32>
    %28 = arith.maximumf %23, %25 : vector<1x16x128xf32>
    %29 = arith.minimumf %23, %25 : vector<1x16x128xf32>
    %30 = arith.maximumf %26, %28 : vector<1x16x128xf32>
    %31 = arith.minimumf %26, %28 : vector<1x16x128xf32>
    %32 = arith.maximumf %27, %29 : vector<1x16x128xf32>
    %33 = arith.minimumf %27, %29 : vector<1x16x128xf32>
    %34 = arith.maximumf %31, %32 : vector<1x16x128xf32>
    %35 = arith.minimumf %31, %32 : vector<1x16x128xf32>
    %c0_24 = arith.constant 0 : index
    %c8 = arith.constant 8 : index
    %c0_25 = arith.constant 0 : index
    %c0_26 = arith.constant 0 : index
    %36 = vector.load %arg1[%c0_24, %c8, %c0_25, %c0_26] : memref<1x49x16x128xf32, #tpu.memory_space<vmem>>, vector<1x1x16x128xf32>
    %37 = vector.shape_cast %36 : vector<1x1x16x128xf32> to vector<1x16x128xf32>
    %38 = arith.maximumf %12, %37 : vector<1x16x128xf32>
    %39 = arith.minimumf %12, %37 : vector<1x16x128xf32>
    %40 = arith.maximumf %16, %39 : vector<1x16x128xf32>
    %41 = arith.minimumf %16, %39 : vector<1x16x128xf32>
    %42 = arith.maximumf %17, %41 : vector<1x16x128xf32>
    %43 = arith.minimumf %17, %41 : vector<1x16x128xf32>
    %44 = arith.maximumf %15, %43 : vector<1x16x128xf32>
    %c0_27 = arith.constant 0 : index
    %c9 = arith.constant 9 : index
    %c0_28 = arith.constant 0 : index
    %c0_29 = arith.constant 0 : index
    %45 = vector.load %arg1[%c0_27, %c9, %c0_28, %c0_29] : memref<1x49x16x128xf32, #tpu.memory_space<vmem>>, vector<1x1x16x128xf32>
    %46 = vector.shape_cast %45 : vector<1x1x16x128xf32> to vector<1x16x128xf32>
    %47 = arith.maximumf %30, %46 : vector<1x16x128xf32>
    %48 = arith.minimumf %30, %46 : vector<1x16x128xf32>
    %49 = arith.maximumf %34, %48 : vector<1x16x128xf32>
    %50 = arith.minimumf %34, %48 : vector<1x16x128xf32>
    %51 = arith.maximumf %35, %50 : vector<1x16x128xf32>
    %52 = arith.minimumf %35, %50 : vector<1x16x128xf32>
    %53 = arith.maximumf %33, %52 : vector<1x16x128xf32>
    %c0_30 = arith.constant 0 : index
    %c10 = arith.constant 10 : index
    %c0_31 = arith.constant 0 : index
    %c0_32 = arith.constant 0 : index
    %54 = vector.load %arg1[%c0_30, %c10, %c0_31, %c0_32] : memref<1x49x16x128xf32, #tpu.memory_space<vmem>>, vector<1x1x16x128xf32>
    %55 = vector.shape_cast %54 : vector<1x1x16x128xf32> to vector<1x16x128xf32>
    %56 = arith.maximumf %38, %55 : vector<1x16x128xf32>
    %57 = arith.minimumf %38, %55 : vector<1x16x128xf32>
    %58 = arith.maximumf %40, %57 : vector<1x16x128xf32>
    %59 = arith.minimumf %40, %57 : vector<1x16x128xf32>
    %60 = arith.maximumf %42, %59 : vector<1x16x128xf32>
    %61 = arith.minimumf %42, %59 : vector<1x16x128xf32>
    %62 = arith.maximumf %44, %61 : vector<1x16x128xf32>
    %c0_33 = arith.constant 0 : index
    %c11 = arith.constant 11 : index
    %c0_34 = arith.constant 0 : index
    %c0_35 = arith.constant 0 : index
    %63 = vector.load %arg1[%c0_33, %c11, %c0_34, %c0_35] : memref<1x49x16x128xf32, #tpu.memory_space<vmem>>, vector<1x1x16x128xf32>
    %64 = vector.shape_cast %63 : vector<1x1x16x128xf32> to vector<1x16x128xf32>
    %65 = arith.maximumf %47, %64 : vector<1x16x128xf32>
    %66 = arith.minimumf %47, %64 : vector<1x16x128xf32>
    %67 = arith.maximumf %49, %66 : vector<1x16x128xf32>
    %68 = arith.minimumf %49, %66 : vector<1x16x128xf32>
    %69 = arith.maximumf %51, %68 : vector<1x16x128xf32>
    %70 = arith.minimumf %51, %68 : vector<1x16x128xf32>
    %71 = arith.maximumf %53, %70 : vector<1x16x128xf32>
    %c0_36 = arith.constant 0 : index
    %c12 = arith.constant 12 : index
    %c0_37 = arith.constant 0 : index
    %c0_38 = arith.constant 0 : index
    %72 = vector.load %arg1[%c0_36, %c12, %c0_37, %c0_38] : memref<1x49x16x128xf32, #tpu.memory_space<vmem>>, vector<1x1x16x128xf32>
    %73 = vector.shape_cast %72 : vector<1x1x16x128xf32> to vector<1x16x128xf32>
    %74 = arith.maximumf %56, %73 : vector<1x16x128xf32>
    %75 = arith.minimumf %56, %73 : vector<1x16x128xf32>
    %76 = arith.maximumf %58, %75 : vector<1x16x128xf32>
    %77 = arith.minimumf %58, %75 : vector<1x16x128xf32>
    %78 = arith.maximumf %60, %77 : vector<1x16x128xf32>
    %79 = arith.minimumf %60, %77 : vector<1x16x128xf32>
    %80 = arith.maximumf %62, %79 : vector<1x16x128xf32>
    %c0_39 = arith.constant 0 : index
    %c13 = arith.constant 13 : index
    %c0_40 = arith.constant 0 : index
    %c0_41 = arith.constant 0 : index
    %81 = vector.load %arg1[%c0_39, %c13, %c0_40, %c0_41] : memref<1x49x16x128xf32, #tpu.memory_space<vmem>>, vector<1x1x16x128xf32>
    %82 = vector.shape_cast %81 : vector<1x1x16x128xf32> to vector<1x16x128xf32>
    %83 = arith.maximumf %65, %82 : vector<1x16x128xf32>
    %84 = arith.minimumf %65, %82 : vector<1x16x128xf32>
    %85 = arith.maximumf %67, %84 : vector<1x16x128xf32>
    %86 = arith.minimumf %67, %84 : vector<1x16x128xf32>
    %87 = arith.maximumf %69, %86 : vector<1x16x128xf32>
    %88 = arith.minimumf %69, %86 : vector<1x16x128xf32>
    %89 = arith.maximumf %71, %88 : vector<1x16x128xf32>
    %c0_42 = arith.constant 0 : index
    %c14 = arith.constant 14 : index
    %c0_43 = arith.constant 0 : index
    %c0_44 = arith.constant 0 : index
    %90 = vector.load %arg1[%c0_42, %c14, %c0_43, %c0_44] : memref<1x49x16x128xf32, #tpu.memory_space<vmem>>, vector<1x1x16x128xf32>
    %91 = vector.shape_cast %90 : vector<1x1x16x128xf32> to vector<1x16x128xf32>
    %92 = arith.maximumf %74, %91 : vector<1x16x128xf32>
    %93 = arith.minimumf %74, %91 : vector<1x16x128xf32>
    %94 = arith.maximumf %76, %93 : vector<1x16x128xf32>
    %95 = arith.minimumf %76, %93 : vector<1x16x128xf32>
    %96 = arith.maximumf %78, %95 : vector<1x16x128xf32>
    %97 = arith.minimumf %78, %95 : vector<1x16x128xf32>
    %98 = arith.maximumf %80, %97 : vector<1x16x128xf32>
    %c0_45 = arith.constant 0 : index
    %c15 = arith.constant 15 : index
    %c0_46 = arith.constant 0 : index
    %c0_47 = arith.constant 0 : index
    %99 = vector.load %arg1[%c0_45, %c15, %c0_46, %c0_47] : memref<1x49x16x128xf32, #tpu.memory_space<vmem>>, vector<1x1x16x128xf32>
    %100 = vector.shape_cast %99 : vector<1x1x16x128xf32> to vector<1x16x128xf32>
    %101 = arith.maximumf %83, %100 : vector<1x16x128xf32>
    %102 = arith.minimumf %83, %100 : vector<1x16x128xf32>
    %103 = arith.maximumf %85, %102 : vector<1x16x128xf32>
    %104 = arith.minimumf %85, %102 : vector<1x16x128xf32>
    %105 = arith.maximumf %87, %104 : vector<1x16x128xf32>
    %106 = arith.minimumf %87, %104 : vector<1x16x128xf32>
    %107 = arith.maximumf %89, %106 : vector<1x16x128xf32>
    %c0_48 = arith.constant 0 : index
    %c16 = arith.constant 16 : index
    %c0_49 = arith.constant 0 : index
    %c0_50 = arith.constant 0 : index
    %108 = vector.load %arg1[%c0_48, %c16, %c0_49, %c0_50] : memref<1x49x16x128xf32, #tpu.memory_space<vmem>>, vector<1x1x16x128xf32>
    %109 = vector.shape_cast %108 : vector<1x1x16x128xf32> to vector<1x16x128xf32>
    %110 = arith.maximumf %92, %109 : vector<1x16x128xf32>
    %111 = arith.minimumf %92, %109 : vector<1x16x128xf32>
    %112 = arith.maximumf %94, %111 : vector<1x16x128xf32>
    %113 = arith.minimumf %94, %111 : vector<1x16x128xf32>
    %114 = arith.maximumf %96, %113 : vector<1x16x128xf32>
    %115 = arith.minimumf %96, %113 : vector<1x16x128xf32>
    %116 = arith.maximumf %98, %115 : vector<1x16x128xf32>
    %c0_51 = arith.constant 0 : index
    %c17 = arith.constant 17 : index
    %c0_52 = arith.constant 0 : index
    %c0_53 = arith.constant 0 : index
    %117 = vector.load %arg1[%c0_51, %c17, %c0_52, %c0_53] : memref<1x49x16x128xf32, #tpu.memory_space<vmem>>, vector<1x1x16x128xf32>
    %118 = vector.shape_cast %117 : vector<1x1x16x128xf32> to vector<1x16x128xf32>
    %119 = arith.maximumf %101, %118 : vector<1x16x128xf32>
    %120 = arith.minimumf %101, %118 : vector<1x16x128xf32>
    %121 = arith.maximumf %103, %120 : vector<1x16x128xf32>
    %122 = arith.minimumf %103, %120 : vector<1x16x128xf32>
    %123 = arith.maximumf %105, %122 : vector<1x16x128xf32>
    %124 = arith.minimumf %105, %122 : vector<1x16x128xf32>
    %125 = arith.maximumf %107, %124 : vector<1x16x128xf32>
    %c0_54 = arith.constant 0 : index
    %c18 = arith.constant 18 : index
    %c0_55 = arith.constant 0 : index
    %c0_56 = arith.constant 0 : index
    %126 = vector.load %arg1[%c0_54, %c18, %c0_55, %c0_56] : memref<1x49x16x128xf32, #tpu.memory_space<vmem>>, vector<1x1x16x128xf32>
    %127 = vector.shape_cast %126 : vector<1x1x16x128xf32> to vector<1x16x128xf32>
    %128 = arith.maximumf %110, %127 : vector<1x16x128xf32>
    %129 = arith.minimumf %110, %127 : vector<1x16x128xf32>
    %130 = arith.maximumf %112, %129 : vector<1x16x128xf32>
    %131 = arith.minimumf %112, %129 : vector<1x16x128xf32>
    %132 = arith.maximumf %114, %131 : vector<1x16x128xf32>
    %133 = arith.minimumf %114, %131 : vector<1x16x128xf32>
    %134 = arith.maximumf %116, %133 : vector<1x16x128xf32>
    %c0_57 = arith.constant 0 : index
    %c19 = arith.constant 19 : index
    %c0_58 = arith.constant 0 : index
    %c0_59 = arith.constant 0 : index
    %135 = vector.load %arg1[%c0_57, %c19, %c0_58, %c0_59] : memref<1x49x16x128xf32, #tpu.memory_space<vmem>>, vector<1x1x16x128xf32>
    %136 = vector.shape_cast %135 : vector<1x1x16x128xf32> to vector<1x16x128xf32>
    %137 = arith.maximumf %119, %136 : vector<1x16x128xf32>
    %138 = arith.minimumf %119, %136 : vector<1x16x128xf32>
    %139 = arith.maximumf %121, %138 : vector<1x16x128xf32>
    %140 = arith.minimumf %121, %138 : vector<1x16x128xf32>
    %141 = arith.maximumf %123, %140 : vector<1x16x128xf32>
    %142 = arith.minimumf %123, %140 : vector<1x16x128xf32>
    %143 = arith.maximumf %125, %142 : vector<1x16x128xf32>
    %c0_60 = arith.constant 0 : index
    %c20 = arith.constant 20 : index
    %c0_61 = arith.constant 0 : index
    %c0_62 = arith.constant 0 : index
    %144 = vector.load %arg1[%c0_60, %c20, %c0_61, %c0_62] : memref<1x49x16x128xf32, #tpu.memory_space<vmem>>, vector<1x1x16x128xf32>
    %145 = vector.shape_cast %144 : vector<1x1x16x128xf32> to vector<1x16x128xf32>
    %146 = arith.maximumf %128, %145 : vector<1x16x128xf32>
    %147 = arith.minimumf %128, %145 : vector<1x16x128xf32>
    %148 = arith.maximumf %130, %147 : vector<1x16x128xf32>
    %149 = arith.minimumf %130, %147 : vector<1x16x128xf32>
    %150 = arith.maximumf %132, %149 : vector<1x16x128xf32>
    %151 = arith.minimumf %132, %149 : vector<1x16x128xf32>
    %152 = arith.maximumf %134, %151 : vector<1x16x128xf32>
    %c0_63 = arith.constant 0 : index
    %c21 = arith.constant 21 : index
    %c0_64 = arith.constant 0 : index
    %c0_65 = arith.constant 0 : index
    %153 = vector.load %arg1[%c0_63, %c21, %c0_64, %c0_65] : memref<1x49x16x128xf32, #tpu.memory_space<vmem>>, vector<1x1x16x128xf32>
    %154 = vector.shape_cast %153 : vector<1x1x16x128xf32> to vector<1x16x128xf32>
    %155 = arith.maximumf %137, %154 : vector<1x16x128xf32>
    %156 = arith.minimumf %137, %154 : vector<1x16x128xf32>
    %157 = arith.maximumf %139, %156 : vector<1x16x128xf32>
    %158 = arith.minimumf %139, %156 : vector<1x16x128xf32>
    %159 = arith.maximumf %141, %158 : vector<1x16x128xf32>
    %160 = arith.minimumf %141, %158 : vector<1x16x128xf32>
    %161 = arith.maximumf %143, %160 : vector<1x16x128xf32>
    %c0_66 = arith.constant 0 : index
    %c22 = arith.constant 22 : index
    %c0_67 = arith.constant 0 : index
    %c0_68 = arith.constant 0 : index
    %162 = vector.load %arg1[%c0_66, %c22, %c0_67, %c0_68] : memref<1x49x16x128xf32, #tpu.memory_space<vmem>>, vector<1x1x16x128xf32>
    %163 = vector.shape_cast %162 : vector<1x1x16x128xf32> to vector<1x16x128xf32>
    %164 = arith.maximumf %146, %163 : vector<1x16x128xf32>
    %165 = arith.minimumf %146, %163 : vector<1x16x128xf32>
    %166 = arith.maximumf %148, %165 : vector<1x16x128xf32>
    %167 = arith.minimumf %148, %165 : vector<1x16x128xf32>
    %168 = arith.maximumf %150, %167 : vector<1x16x128xf32>
    %169 = arith.minimumf %150, %167 : vector<1x16x128xf32>
    %170 = arith.maximumf %152, %169 : vector<1x16x128xf32>
    %c0_69 = arith.constant 0 : index
    %c23 = arith.constant 23 : index
    %c0_70 = arith.constant 0 : index
    %c0_71 = arith.constant 0 : index
    %171 = vector.load %arg1[%c0_69, %c23, %c0_70, %c0_71] : memref<1x49x16x128xf32, #tpu.memory_space<vmem>>, vector<1x1x16x128xf32>
    %172 = vector.shape_cast %171 : vector<1x1x16x128xf32> to vector<1x16x128xf32>
    %173 = arith.maximumf %155, %172 : vector<1x16x128xf32>
    %174 = arith.minimumf %155, %172 : vector<1x16x128xf32>
    %175 = arith.maximumf %157, %174 : vector<1x16x128xf32>
    %176 = arith.minimumf %157, %174 : vector<1x16x128xf32>
    %177 = arith.maximumf %159, %176 : vector<1x16x128xf32>
    %178 = arith.minimumf %159, %176 : vector<1x16x128xf32>
    %179 = arith.maximumf %161, %178 : vector<1x16x128xf32>
    %c0_72 = arith.constant 0 : index
    %c24 = arith.constant 24 : index
    %c0_73 = arith.constant 0 : index
    %c0_74 = arith.constant 0 : index
    %180 = vector.load %arg1[%c0_72, %c24, %c0_73, %c0_74] : memref<1x49x16x128xf32, #tpu.memory_space<vmem>>, vector<1x1x16x128xf32>
    %181 = vector.shape_cast %180 : vector<1x1x16x128xf32> to vector<1x16x128xf32>
    %182 = arith.maximumf %164, %181 : vector<1x16x128xf32>
    %183 = arith.minimumf %164, %181 : vector<1x16x128xf32>
    %184 = arith.maximumf %166, %183 : vector<1x16x128xf32>
    %185 = arith.minimumf %166, %183 : vector<1x16x128xf32>
    %186 = arith.maximumf %168, %185 : vector<1x16x128xf32>
    %187 = arith.minimumf %168, %185 : vector<1x16x128xf32>
    %188 = arith.maximumf %170, %187 : vector<1x16x128xf32>
    %c0_75 = arith.constant 0 : index
    %c25 = arith.constant 25 : index
    %c0_76 = arith.constant 0 : index
    %c0_77 = arith.constant 0 : index
    %189 = vector.load %arg1[%c0_75, %c25, %c0_76, %c0_77] : memref<1x49x16x128xf32, #tpu.memory_space<vmem>>, vector<1x1x16x128xf32>
    %190 = vector.shape_cast %189 : vector<1x1x16x128xf32> to vector<1x16x128xf32>
    %191 = arith.maximumf %173, %190 : vector<1x16x128xf32>
    %192 = arith.minimumf %173, %190 : vector<1x16x128xf32>
    %193 = arith.maximumf %175, %192 : vector<1x16x128xf32>
    %194 = arith.minimumf %175, %192 : vector<1x16x128xf32>
    %195 = arith.maximumf %177, %194 : vector<1x16x128xf32>
    %196 = arith.minimumf %177, %194 : vector<1x16x128xf32>
    %197 = arith.maximumf %179, %196 : vector<1x16x128xf32>
    %c0_78 = arith.constant 0 : index
    %c26 = arith.constant 26 : index
    %c0_79 = arith.constant 0 : index
    %c0_80 = arith.constant 0 : index
    %198 = vector.load %arg1[%c0_78, %c26, %c0_79, %c0_80] : memref<1x49x16x128xf32, #tpu.memory_space<vmem>>, vector<1x1x16x128xf32>
    %199 = vector.shape_cast %198 : vector<1x1x16x128xf32> to vector<1x16x128xf32>
    %200 = arith.maximumf %182, %199 : vector<1x16x128xf32>
    %201 = arith.minimumf %182, %199 : vector<1x16x128xf32>
    %202 = arith.maximumf %184, %201 : vector<1x16x128xf32>
    %203 = arith.minimumf %184, %201 : vector<1x16x128xf32>
    %204 = arith.maximumf %186, %203 : vector<1x16x128xf32>
    %205 = arith.minimumf %186, %203 : vector<1x16x128xf32>
    %206 = arith.maximumf %188, %205 : vector<1x16x128xf32>
    %c0_81 = arith.constant 0 : index
    %c27 = arith.constant 27 : index
    %c0_82 = arith.constant 0 : index
    %c0_83 = arith.constant 0 : index
    %207 = vector.load %arg1[%c0_81, %c27, %c0_82, %c0_83] : memref<1x49x16x128xf32, #tpu.memory_space<vmem>>, vector<1x1x16x128xf32>
    %208 = vector.shape_cast %207 : vector<1x1x16x128xf32> to vector<1x16x128xf32>
    %209 = arith.maximumf %191, %208 : vector<1x16x128xf32>
    %210 = arith.minimumf %191, %208 : vector<1x16x128xf32>
    %211 = arith.maximumf %193, %210 : vector<1x16x128xf32>
    %212 = arith.minimumf %193, %210 : vector<1x16x128xf32>
    %213 = arith.maximumf %195, %212 : vector<1x16x128xf32>
    %214 = arith.minimumf %195, %212 : vector<1x16x128xf32>
    %215 = arith.maximumf %197, %214 : vector<1x16x128xf32>
    %c0_84 = arith.constant 0 : index
    %c28 = arith.constant 28 : index
    %c0_85 = arith.constant 0 : index
    %c0_86 = arith.constant 0 : index
    %216 = vector.load %arg1[%c0_84, %c28, %c0_85, %c0_86] : memref<1x49x16x128xf32, #tpu.memory_space<vmem>>, vector<1x1x16x128xf32>
    %217 = vector.shape_cast %216 : vector<1x1x16x128xf32> to vector<1x16x128xf32>
    %218 = arith.maximumf %200, %217 : vector<1x16x128xf32>
    %219 = arith.minimumf %200, %217 : vector<1x16x128xf32>
    %220 = arith.maximumf %202, %219 : vector<1x16x128xf32>
    %221 = arith.minimumf %202, %219 : vector<1x16x128xf32>
    %222 = arith.maximumf %204, %221 : vector<1x16x128xf32>
    %223 = arith.minimumf %204, %221 : vector<1x16x128xf32>
    %224 = arith.maximumf %206, %223 : vector<1x16x128xf32>
    %c0_87 = arith.constant 0 : index
    %c29 = arith.constant 29 : index
    %c0_88 = arith.constant 0 : index
    %c0_89 = arith.constant 0 : index
    %225 = vector.load %arg1[%c0_87, %c29, %c0_88, %c0_89] : memref<1x49x16x128xf32, #tpu.memory_space<vmem>>, vector<1x1x16x128xf32>
    %226 = vector.shape_cast %225 : vector<1x1x16x128xf32> to vector<1x16x128xf32>
    %227 = arith.maximumf %209, %226 : vector<1x16x128xf32>
    %228 = arith.minimumf %209, %226 : vector<1x16x128xf32>
    %229 = arith.maximumf %211, %228 : vector<1x16x128xf32>
    %230 = arith.minimumf %211, %228 : vector<1x16x128xf32>
    %231 = arith.maximumf %213, %230 : vector<1x16x128xf32>
    %232 = arith.minimumf %213, %230 : vector<1x16x128xf32>
    %233 = arith.maximumf %215, %232 : vector<1x16x128xf32>
    %c0_90 = arith.constant 0 : index
    %c30 = arith.constant 30 : index
    %c0_91 = arith.constant 0 : index
    %c0_92 = arith.constant 0 : index
    %234 = vector.load %arg1[%c0_90, %c30, %c0_91, %c0_92] : memref<1x49x16x128xf32, #tpu.memory_space<vmem>>, vector<1x1x16x128xf32>
    %235 = vector.shape_cast %234 : vector<1x1x16x128xf32> to vector<1x16x128xf32>
    %236 = arith.maximumf %218, %235 : vector<1x16x128xf32>
    %237 = arith.minimumf %218, %235 : vector<1x16x128xf32>
    %238 = arith.maximumf %220, %237 : vector<1x16x128xf32>
    %239 = arith.minimumf %220, %237 : vector<1x16x128xf32>
    %240 = arith.maximumf %222, %239 : vector<1x16x128xf32>
    %241 = arith.minimumf %222, %239 : vector<1x16x128xf32>
    %242 = arith.maximumf %224, %241 : vector<1x16x128xf32>
    %c0_93 = arith.constant 0 : index
    %c31 = arith.constant 31 : index
    %c0_94 = arith.constant 0 : index
    %c0_95 = arith.constant 0 : index
    %243 = vector.load %arg1[%c0_93, %c31, %c0_94, %c0_95] : memref<1x49x16x128xf32, #tpu.memory_space<vmem>>, vector<1x1x16x128xf32>
    %244 = vector.shape_cast %243 : vector<1x1x16x128xf32> to vector<1x16x128xf32>
    %245 = arith.maximumf %227, %244 : vector<1x16x128xf32>
    %246 = arith.minimumf %227, %244 : vector<1x16x128xf32>
    %247 = arith.maximumf %229, %246 : vector<1x16x128xf32>
    %248 = arith.minimumf %229, %246 : vector<1x16x128xf32>
    %249 = arith.maximumf %231, %248 : vector<1x16x128xf32>
    %250 = arith.minimumf %231, %248 : vector<1x16x128xf32>
    %251 = arith.maximumf %233, %250 : vector<1x16x128xf32>
    %c0_96 = arith.constant 0 : index
    %c32 = arith.constant 32 : index
    %c0_97 = arith.constant 0 : index
    %c0_98 = arith.constant 0 : index
    %252 = vector.load %arg1[%c0_96, %c32, %c0_97, %c0_98] : memref<1x49x16x128xf32, #tpu.memory_space<vmem>>, vector<1x1x16x128xf32>
    %253 = vector.shape_cast %252 : vector<1x1x16x128xf32> to vector<1x16x128xf32>
    %254 = arith.maximumf %236, %253 : vector<1x16x128xf32>
    %255 = arith.minimumf %236, %253 : vector<1x16x128xf32>
    %256 = arith.maximumf %238, %255 : vector<1x16x128xf32>
    %257 = arith.minimumf %238, %255 : vector<1x16x128xf32>
    %258 = arith.maximumf %240, %257 : vector<1x16x128xf32>
    %259 = arith.minimumf %240, %257 : vector<1x16x128xf32>
    %260 = arith.maximumf %242, %259 : vector<1x16x128xf32>
    %c0_99 = arith.constant 0 : index
    %c33 = arith.constant 33 : index
    %c0_100 = arith.constant 0 : index
    %c0_101 = arith.constant 0 : index
    %261 = vector.load %arg1[%c0_99, %c33, %c0_100, %c0_101] : memref<1x49x16x128xf32, #tpu.memory_space<vmem>>, vector<1x1x16x128xf32>
    %262 = vector.shape_cast %261 : vector<1x1x16x128xf32> to vector<1x16x128xf32>
    %263 = arith.maximumf %245, %262 : vector<1x16x128xf32>
    %264 = arith.minimumf %245, %262 : vector<1x16x128xf32>
    %265 = arith.maximumf %247, %264 : vector<1x16x128xf32>
    %266 = arith.minimumf %247, %264 : vector<1x16x128xf32>
    %267 = arith.maximumf %249, %266 : vector<1x16x128xf32>
    %268 = arith.minimumf %249, %266 : vector<1x16x128xf32>
    %269 = arith.maximumf %251, %268 : vector<1x16x128xf32>
    %c0_102 = arith.constant 0 : index
    %c34 = arith.constant 34 : index
    %c0_103 = arith.constant 0 : index
    %c0_104 = arith.constant 0 : index
    %270 = vector.load %arg1[%c0_102, %c34, %c0_103, %c0_104] : memref<1x49x16x128xf32, #tpu.memory_space<vmem>>, vector<1x1x16x128xf32>
    %271 = vector.shape_cast %270 : vector<1x1x16x128xf32> to vector<1x16x128xf32>
    %272 = arith.maximumf %254, %271 : vector<1x16x128xf32>
    %273 = arith.minimumf %254, %271 : vector<1x16x128xf32>
    %274 = arith.maximumf %256, %273 : vector<1x16x128xf32>
    %275 = arith.minimumf %256, %273 : vector<1x16x128xf32>
    %276 = arith.maximumf %258, %275 : vector<1x16x128xf32>
    %277 = arith.minimumf %258, %275 : vector<1x16x128xf32>
    %278 = arith.maximumf %260, %277 : vector<1x16x128xf32>
    %c0_105 = arith.constant 0 : index
    %c35 = arith.constant 35 : index
    %c0_106 = arith.constant 0 : index
    %c0_107 = arith.constant 0 : index
    %279 = vector.load %arg1[%c0_105, %c35, %c0_106, %c0_107] : memref<1x49x16x128xf32, #tpu.memory_space<vmem>>, vector<1x1x16x128xf32>
    %280 = vector.shape_cast %279 : vector<1x1x16x128xf32> to vector<1x16x128xf32>
    %281 = arith.maximumf %263, %280 : vector<1x16x128xf32>
    %282 = arith.minimumf %263, %280 : vector<1x16x128xf32>
    %283 = arith.maximumf %265, %282 : vector<1x16x128xf32>
    %284 = arith.minimumf %265, %282 : vector<1x16x128xf32>
    %285 = arith.maximumf %267, %284 : vector<1x16x128xf32>
    %286 = arith.minimumf %267, %284 : vector<1x16x128xf32>
    %287 = arith.maximumf %269, %286 : vector<1x16x128xf32>
    %c0_108 = arith.constant 0 : index
    %c36 = arith.constant 36 : index
    %c0_109 = arith.constant 0 : index
    %c0_110 = arith.constant 0 : index
    %288 = vector.load %arg1[%c0_108, %c36, %c0_109, %c0_110] : memref<1x49x16x128xf32, #tpu.memory_space<vmem>>, vector<1x1x16x128xf32>
    %289 = vector.shape_cast %288 : vector<1x1x16x128xf32> to vector<1x16x128xf32>
    %290 = arith.maximumf %272, %289 : vector<1x16x128xf32>
    %291 = arith.minimumf %272, %289 : vector<1x16x128xf32>
    %292 = arith.maximumf %274, %291 : vector<1x16x128xf32>
    %293 = arith.minimumf %274, %291 : vector<1x16x128xf32>
    %294 = arith.maximumf %276, %293 : vector<1x16x128xf32>
    %295 = arith.minimumf %276, %293 : vector<1x16x128xf32>
    %296 = arith.maximumf %278, %295 : vector<1x16x128xf32>
    %c0_111 = arith.constant 0 : index
    %c37 = arith.constant 37 : index
    %c0_112 = arith.constant 0 : index
    %c0_113 = arith.constant 0 : index
    %297 = vector.load %arg1[%c0_111, %c37, %c0_112, %c0_113] : memref<1x49x16x128xf32, #tpu.memory_space<vmem>>, vector<1x1x16x128xf32>
    %298 = vector.shape_cast %297 : vector<1x1x16x128xf32> to vector<1x16x128xf32>
    %299 = arith.maximumf %281, %298 : vector<1x16x128xf32>
    %300 = arith.minimumf %281, %298 : vector<1x16x128xf32>
    %301 = arith.maximumf %283, %300 : vector<1x16x128xf32>
    %302 = arith.minimumf %283, %300 : vector<1x16x128xf32>
    %303 = arith.maximumf %285, %302 : vector<1x16x128xf32>
    %304 = arith.minimumf %285, %302 : vector<1x16x128xf32>
    %305 = arith.maximumf %287, %304 : vector<1x16x128xf32>
    %c0_114 = arith.constant 0 : index
    %c38 = arith.constant 38 : index
    %c0_115 = arith.constant 0 : index
    %c0_116 = arith.constant 0 : index
    %306 = vector.load %arg1[%c0_114, %c38, %c0_115, %c0_116] : memref<1x49x16x128xf32, #tpu.memory_space<vmem>>, vector<1x1x16x128xf32>
    %307 = vector.shape_cast %306 : vector<1x1x16x128xf32> to vector<1x16x128xf32>
    %308 = arith.maximumf %290, %307 : vector<1x16x128xf32>
    %309 = arith.minimumf %290, %307 : vector<1x16x128xf32>
    %310 = arith.maximumf %292, %309 : vector<1x16x128xf32>
    %311 = arith.minimumf %292, %309 : vector<1x16x128xf32>
    %312 = arith.maximumf %294, %311 : vector<1x16x128xf32>
    %313 = arith.minimumf %294, %311 : vector<1x16x128xf32>
    %314 = arith.maximumf %296, %313 : vector<1x16x128xf32>
    %c0_117 = arith.constant 0 : index
    %c39 = arith.constant 39 : index
    %c0_118 = arith.constant 0 : index
    %c0_119 = arith.constant 0 : index
    %315 = vector.load %arg1[%c0_117, %c39, %c0_118, %c0_119] : memref<1x49x16x128xf32, #tpu.memory_space<vmem>>, vector<1x1x16x128xf32>
    %316 = vector.shape_cast %315 : vector<1x1x16x128xf32> to vector<1x16x128xf32>
    %317 = arith.maximumf %299, %316 : vector<1x16x128xf32>
    %318 = arith.minimumf %299, %316 : vector<1x16x128xf32>
    %319 = arith.maximumf %301, %318 : vector<1x16x128xf32>
    %320 = arith.minimumf %301, %318 : vector<1x16x128xf32>
    %321 = arith.maximumf %303, %320 : vector<1x16x128xf32>
    %322 = arith.minimumf %303, %320 : vector<1x16x128xf32>
    %323 = arith.maximumf %305, %322 : vector<1x16x128xf32>
    %c0_120 = arith.constant 0 : index
    %c40 = arith.constant 40 : index
    %c0_121 = arith.constant 0 : index
    %c0_122 = arith.constant 0 : index
    %324 = vector.load %arg1[%c0_120, %c40, %c0_121, %c0_122] : memref<1x49x16x128xf32, #tpu.memory_space<vmem>>, vector<1x1x16x128xf32>
    %325 = vector.shape_cast %324 : vector<1x1x16x128xf32> to vector<1x16x128xf32>
    %326 = arith.maximumf %308, %325 : vector<1x16x128xf32>
    %327 = arith.minimumf %308, %325 : vector<1x16x128xf32>
    %328 = arith.maximumf %310, %327 : vector<1x16x128xf32>
    %329 = arith.minimumf %310, %327 : vector<1x16x128xf32>
    %330 = arith.maximumf %312, %329 : vector<1x16x128xf32>
    %331 = arith.minimumf %312, %329 : vector<1x16x128xf32>
    %332 = arith.maximumf %314, %331 : vector<1x16x128xf32>
    %c0_123 = arith.constant 0 : index
    %c41 = arith.constant 41 : index
    %c0_124 = arith.constant 0 : index
    %c0_125 = arith.constant 0 : index
    %333 = vector.load %arg1[%c0_123, %c41, %c0_124, %c0_125] : memref<1x49x16x128xf32, #tpu.memory_space<vmem>>, vector<1x1x16x128xf32>
    %334 = vector.shape_cast %333 : vector<1x1x16x128xf32> to vector<1x16x128xf32>
    %335 = arith.maximumf %317, %334 : vector<1x16x128xf32>
    %336 = arith.minimumf %317, %334 : vector<1x16x128xf32>
    %337 = arith.maximumf %319, %336 : vector<1x16x128xf32>
    %338 = arith.minimumf %319, %336 : vector<1x16x128xf32>
    %339 = arith.maximumf %321, %338 : vector<1x16x128xf32>
    %340 = arith.minimumf %321, %338 : vector<1x16x128xf32>
    %341 = arith.maximumf %323, %340 : vector<1x16x128xf32>
    %c0_126 = arith.constant 0 : index
    %c42 = arith.constant 42 : index
    %c0_127 = arith.constant 0 : index
    %c0_128 = arith.constant 0 : index
    %342 = vector.load %arg1[%c0_126, %c42, %c0_127, %c0_128] : memref<1x49x16x128xf32, #tpu.memory_space<vmem>>, vector<1x1x16x128xf32>
    %343 = vector.shape_cast %342 : vector<1x1x16x128xf32> to vector<1x16x128xf32>
    %344 = arith.maximumf %326, %343 : vector<1x16x128xf32>
    %345 = arith.minimumf %326, %343 : vector<1x16x128xf32>
    %346 = arith.maximumf %328, %345 : vector<1x16x128xf32>
    %347 = arith.minimumf %328, %345 : vector<1x16x128xf32>
    %348 = arith.maximumf %330, %347 : vector<1x16x128xf32>
    %349 = arith.minimumf %330, %347 : vector<1x16x128xf32>
    %350 = arith.maximumf %332, %349 : vector<1x16x128xf32>
    %c0_129 = arith.constant 0 : index
    %c43 = arith.constant 43 : index
    %c0_130 = arith.constant 0 : index
    %c0_131 = arith.constant 0 : index
    %351 = vector.load %arg1[%c0_129, %c43, %c0_130, %c0_131] : memref<1x49x16x128xf32, #tpu.memory_space<vmem>>, vector<1x1x16x128xf32>
    %352 = vector.shape_cast %351 : vector<1x1x16x128xf32> to vector<1x16x128xf32>
    %353 = arith.maximumf %335, %352 : vector<1x16x128xf32>
    %354 = arith.minimumf %335, %352 : vector<1x16x128xf32>
    %355 = arith.maximumf %337, %354 : vector<1x16x128xf32>
    %356 = arith.minimumf %337, %354 : vector<1x16x128xf32>
    %357 = arith.maximumf %339, %356 : vector<1x16x128xf32>
    %358 = arith.minimumf %339, %356 : vector<1x16x128xf32>
    %359 = arith.maximumf %341, %358 : vector<1x16x128xf32>
    %c0_132 = arith.constant 0 : index
    %c44 = arith.constant 44 : index
    %c0_133 = arith.constant 0 : index
    %c0_134 = arith.constant 0 : index
    %360 = vector.load %arg1[%c0_132, %c44, %c0_133, %c0_134] : memref<1x49x16x128xf32, #tpu.memory_space<vmem>>, vector<1x1x16x128xf32>
    %361 = vector.shape_cast %360 : vector<1x1x16x128xf32> to vector<1x16x128xf32>
    %362 = arith.maximumf %344, %361 : vector<1x16x128xf32>
    %363 = arith.minimumf %344, %361 : vector<1x16x128xf32>
    %364 = arith.maximumf %346, %363 : vector<1x16x128xf32>
    %365 = arith.minimumf %346, %363 : vector<1x16x128xf32>
    %366 = arith.maximumf %348, %365 : vector<1x16x128xf32>
    %367 = arith.minimumf %348, %365 : vector<1x16x128xf32>
    %368 = arith.maximumf %350, %367 : vector<1x16x128xf32>
    %c0_135 = arith.constant 0 : index
    %c45 = arith.constant 45 : index
    %c0_136 = arith.constant 0 : index
    %c0_137 = arith.constant 0 : index
    %369 = vector.load %arg1[%c0_135, %c45, %c0_136, %c0_137] : memref<1x49x16x128xf32, #tpu.memory_space<vmem>>, vector<1x1x16x128xf32>
    %370 = vector.shape_cast %369 : vector<1x1x16x128xf32> to vector<1x16x128xf32>
    %371 = arith.maximumf %353, %370 : vector<1x16x128xf32>
    %372 = arith.minimumf %353, %370 : vector<1x16x128xf32>
    %373 = arith.maximumf %355, %372 : vector<1x16x128xf32>
    %374 = arith.minimumf %355, %372 : vector<1x16x128xf32>
    %375 = arith.maximumf %357, %374 : vector<1x16x128xf32>
    %376 = arith.minimumf %357, %374 : vector<1x16x128xf32>
    %377 = arith.maximumf %359, %376 : vector<1x16x128xf32>
    %c0_138 = arith.constant 0 : index
    %c46 = arith.constant 46 : index
    %c0_139 = arith.constant 0 : index
    %c0_140 = arith.constant 0 : index
    %378 = vector.load %arg1[%c0_138, %c46, %c0_139, %c0_140] : memref<1x49x16x128xf32, #tpu.memory_space<vmem>>, vector<1x1x16x128xf32>
    %379 = vector.shape_cast %378 : vector<1x1x16x128xf32> to vector<1x16x128xf32>
    %380 = arith.maximumf %362, %379 : vector<1x16x128xf32>
    %381 = arith.minimumf %362, %379 : vector<1x16x128xf32>
    %382 = arith.maximumf %364, %381 : vector<1x16x128xf32>
    %383 = arith.minimumf %364, %381 : vector<1x16x128xf32>
    %384 = arith.maximumf %366, %383 : vector<1x16x128xf32>
    %385 = arith.minimumf %366, %383 : vector<1x16x128xf32>
    %386 = arith.maximumf %368, %385 : vector<1x16x128xf32>
    %c0_141 = arith.constant 0 : index
    %c47 = arith.constant 47 : index
    %c0_142 = arith.constant 0 : index
    %c0_143 = arith.constant 0 : index
    %387 = vector.load %arg1[%c0_141, %c47, %c0_142, %c0_143] : memref<1x49x16x128xf32, #tpu.memory_space<vmem>>, vector<1x1x16x128xf32>
    %388 = vector.shape_cast %387 : vector<1x1x16x128xf32> to vector<1x16x128xf32>
    %389 = arith.maximumf %371, %388 : vector<1x16x128xf32>
    %390 = arith.minimumf %371, %388 : vector<1x16x128xf32>
    %391 = arith.maximumf %373, %390 : vector<1x16x128xf32>
    %392 = arith.minimumf %373, %390 : vector<1x16x128xf32>
    %393 = arith.maximumf %375, %392 : vector<1x16x128xf32>
    %394 = arith.minimumf %375, %392 : vector<1x16x128xf32>
    %395 = arith.maximumf %377, %394 : vector<1x16x128xf32>
    %c0_144 = arith.constant 0 : index
    %c48 = arith.constant 48 : index
    %c0_145 = arith.constant 0 : index
    %c0_146 = arith.constant 0 : index
    %396 = vector.load %arg1[%c0_144, %c48, %c0_145, %c0_146] : memref<1x49x16x128xf32, #tpu.memory_space<vmem>>, vector<1x1x16x128xf32>
    %397 = vector.shape_cast %396 : vector<1x1x16x128xf32> to vector<1x16x128xf32>
    %398 = arith.maximumf %380, %397 : vector<1x16x128xf32>
    %399 = arith.minimumf %380, %397 : vector<1x16x128xf32>
    %400 = arith.maximumf %382, %399 : vector<1x16x128xf32>
    %401 = arith.minimumf %382, %399 : vector<1x16x128xf32>
    %402 = arith.maximumf %384, %401 : vector<1x16x128xf32>
    %403 = arith.minimumf %384, %401 : vector<1x16x128xf32>
    %404 = arith.maximumf %386, %403 : vector<1x16x128xf32>
    %405 = arith.maximumf %398, %395 : vector<1x16x128xf32>
    %406 = arith.maximumf %400, %393 : vector<1x16x128xf32>
    %407 = arith.addf %405, %406 : vector<1x16x128xf32>
    %408 = arith.maximumf %402, %391 : vector<1x16x128xf32>
    %409 = arith.addf %407, %408 : vector<1x16x128xf32>
    %410 = arith.maximumf %404, %389 : vector<1x16x128xf32>
    %411 = arith.addf %409, %410 : vector<1x16x128xf32>
    %cst = arith.constant 2.500000e-01 : f32
    %412 = vector.broadcast %cst : f32 to vector<1x16x128xf32>
    %413 = arith.mulf %411, %412 : vector<1x16x128xf32>
    %c0_147 = arith.constant 0 : index
    %c0_148 = arith.constant 0 : index
    %c0_149 = arith.constant 0 : index
    %414 = vector.load %arg2[%c0_147, %c0_148, %c0_149] : memref<1x16x128xf32, #tpu.memory_space<vmem>>, vector<1x16x128xf32>
    tpu.vector_store %arg2[%c0_147, %c0_148, %c0_149], %413 {strides = array<i32>} : memref<1x16x128xf32, #tpu.memory_space<vmem>>, vector<1x16x128xf32>,
    return
  }
  func.func @transform_0(%arg0: i32) -> (i32, i32, i32, i32) {
    %c0_i32 = arith.constant 0 : i32
    %c0_i32_0 = arith.constant 0 : i32
    %c0_i32_1 = arith.constant 0 : i32
    %c0_i32_2 = arith.constant 0 : i32
    return %arg0, %c0_i32, %c0_i32_0, %c0_i32_1 : i32, i32, i32, i32
  }
  func.func @transform_1(%arg0: i32) -> (i32, i32, i32) {
    %c0_i32 = arith.constant 0 : i32
    %c0_i32_0 = arith.constant 0 : i32
    %c0_i32_1 = arith.constant 0 : i32
    return %arg0, %c0_i32, %c0_i32_0 : i32, i32, i32
  }
}

</mosaic_0001>

<bundles_post_ra>
// kernel: tpu_custom_call.1
= control target key start
LH: loop header
LB: loop body
LE: loop exit
PB: predicated region body
PF: predicated region fallthrough
CT: control target
= control target key end

     0   :  { %6 = vsyncpa [#allocation3], 0  ;;  %s1576_s0 = inlined_call_operand.hbm [shape: f32[2,49,16,128], index: 0, kind: input, shape index: {}]   ;;  %s1577_s1 = inlined_call_operand.hbm [shape: f32[2,16,128], index: 1, kind: output, shape index: {}]  }
   0x1   :  { %8 = vsyncpa [#allocation3 + $0x1], 0 }
   0x2   :  { %9 = vsyncpa [#allocation4], 0 }
   0x3   :  { %11 = vsyncpa [#allocation4 + $0x1], 0  ;;  %s1271_s6 = smov 0   ;;  %s1273_s7 = smov 0  }
   0x4   :  { %s1275_s8 = smov 0   ;;  %s1277_s9 = smov 0  }
   0x5 LB: > { %s1292_s10 = sadd.s32 4294967295, %s1253_s9   ;;  %s1000_s11 = sadd.s32 4294967294, %s1253_s9   ;;  %s1253_s9 = sphi %s1277_s9, %s1591_s9   ;;  %s1249_s8 = sphi %s1275_s8, %s1590_s8   ;;  %s1245_s7 = sphi %s1273_s7, %s1589_s7   ;;  %s1241_s6 = sphi %s1271_s6, %s1588_s6  }
   0x6   : > { %s1296_s12 = sadd.s32 1, %s1253_s9   ;;  %s24_s13 = sadd.s32 1, %s1249_s8 }
   0x7   : > { %s21_s14 = ssub.s32 %s1253_s9, %s1296_s12  ;;  %p31_p0 = scmp.ne.s32.totalorder %s1249_s8, %s1245_s7 }
   0x8   : > { %p22_p1 = scmp.eq.s32.totalorder %s21_s14, 0  ;;  %p32_p2 = scmp.eq.s32.totalorder %s1253_s9, 0 }
   0x9   : > { %p37_p3 = scmp.ne.s32.totalorder %s1245_s7, %s1241_s6  ;;  %p38_p4 = scmp.eq.s32.totalorder %s1292_s10, 0 }
   0xa   : > { %s1308_s15 = scalar_select %p22_p1, %s1249_s8, %s24_s13  }
   0xb   : > { %p33_p5 = por %p32_p2, %p31_p0  ;;  %p1310_p6 = por %p38_p4, %p37_p3 }
   0xc   : > { %p61_p7 = scmp.eq.s32.totalorder %s1292_s10, 1  ;;  %p67_p8 = scmp.eq.s32.totalorder %s1000_s11, 1 }
   0xd   : > { %s1580_s16 = scalar_select %p1310_p6, 1, 0 }
   0xe   : > { %p1123_p10 = scmp.lt.s32.totalorder %s1253_s9, 2  ;;  %p1317_p11 = por %p61_p7, %p31_p0 }
   0xf   : > { %p1321_p12 = por %p67_p8, %p37_p3  ;;  %s87_s19 = sand.u32 1, %s1249_s8  }
  0x10   : > { %s1581_s17 = scalar_select %p1317_p11, 1, 0 }
  0x11   : > { %s1582_s18 = scalar_select %p1321_p12, 1, 0 }
  0x12   : > { %s1109_s20 = smul.u32 12544, %s1253_s9  ;;  %p1332_p13 = pnand %p1123_p10, %p33_p5 }
  0x13   : > { %s1108_s21 = smul.u32 784, %s87_s19  ;;  %s1338_s28 = scalar_lea.sflag [#allocation3], %s87_s19 }
  0x14   : > { %s1330_s24 = scalar_lea.hbm %s1576_s0, %s1109_s20  ;;  %p1163_p1 = pneg %p1332_p13 }
  0x15   : > { %s91_s26 = scalar_lea.vmem [#allocation2], %s1108_s21  ;;  %s1161_s29 = scalar_lea.hbm %s1330_s24, 12544 }
  0x16   : > { %s98_s27 = sshll.u32 %s91_s26, 4  ;;  %p1162_p0 = scmp.ne.s32.totalorder %s1330_s24, %s1161_s29  ;;  %s1336_s27 = int_to_ptr.vmem [resolvable:$true] %s98_s27 }
  0x17   : > { %s1166_s3 = scalar_lea.hbm %s1576_s0, 25088  ;;  %p1167_p4 = scmp.lt.s32.totalorder %s1330_s24, %s1576_s0 }
  0x18   : > { %p1164_p2 = pnand %p1163_p1, %p1162_p0  ;;  %p1168_p5 = scmp.lt.s32.totalorder %s1166_s3, %s1161_s29 }
  0x1a   : > { %p1165_p3 = pneg %p1164_p2  ;;  %p1169_p7 = por %p1168_p5, %p1167_p4 }
  0x1c   : > { %p1170_p8 = pnand %p1169_p7, %p1165_p3 }
  0x1e   : > { %1173 = shalt.err (!%p1170_p8)
}
  0x1f   : > { %s1174_s11 = scalar_lea.vmem %s1336_s27, 12544  ;;  %s1255_s13 = smov [#allocation2]  }
  0x20   : > { %p1175_p10 = scmp.ne.s32.totalorder %s1336_s27, %s1174_s11  ;;  %s1179_s14 = sshll.u32 %s1255_s13, 4  ;;  %s1180_s14 = int_to_ptr.vmem [resolvable:$false] %s1179_s14 }
  0x21   : > { %s1181_s19 = scalar_lea.vmem %s1180_s14, 25088  ;;  %p1182_p2 = scmp.lt.s32.totalorder %s1336_s27, %s1180_s14 }
  0x22   : > { %p1177_p9 = pnand %p1175_p10, %p1163_p1  ;;  %p1183_p12 = scmp.lt.s32.totalorder %s1181_s19, %s1174_s11 }
  0x24   : > { %p1178_p0 = pneg %p1177_p9  ;;  %p1184_p11 = por %p1183_p12, %p1182_p2 }
  0x26   : > { %p1185_p6 = pnand %p1184_p11, %p1178_p0 }
  0x28   : > { %1188 = shalt.err (!%p1185_p6)
}
  0x29   : > { %s1256_s20 = smov 128   ;;  %s1257_s21 = smov 8  }
  0x2a   : > { %1118 = dma.hbm_to_vmem [thread:$0]  (!%p1332_p13), %s1330_s24, 12544, %s1336_s27, %s1338_s28, %s1256_s20, %s1256_s20, %s1257_s21  }
  0x2b   : > { %p1004_p9 = scmp.ge.s32.totalorder %s1253_s9, 1  ;;  %p106_p1 = scmp.lt.s32.totalorder %s1253_s9, 3 }
  0x2d   : > { %p107_p3 = pnand %p1004_p9, %p106_p1 }
  0x2e   : > { %s1362_s22 = sand.u32 (!%p107_p3), 1, %s1245_s7   ;;  %p1584_p6 = scmp.ne.s32.totalorder (!%p107_p3), %s1580_s16, 0 }
  0x2f   : > { %110 = sbr.rel (%p107_p3) target bundleno = 233 (0xe9), region = 24  ;;  %s113_s26 = scalar_lea.sflag (!%p107_p3), [#allocation3], %s1362_s22 }
  0x30   : > { %s1110_s23 = smul.u32 (!%p107_p3), 784, %s1362_s22 }
  0x32   : > { %s1366_s29 = scalar_lea.vmem (!%p107_p3), [#allocation2], %s1110_s23 }
  0x34   : > { %1232 = dma.done.wait (%p1584_p6), %s113_s26, 12544  }
  0x35   : > { %1234 = vsyncadd (%p1584_p6), %s113_s26, 4294954752  ;;  %v135_v0 = vld [vmem:[%s1366_s29] sm:$0xff]  ;;  %v136_v1 = vld [vmem:[%s1366_s29 + $0x8] sm:$0xff]  ;;  %s1005_s16 = sshll.u32 %s1362_s22, 4  ;;  %s1107_s24 = sshll.u32 %s1292_s10, 8 }
  0x36   : > { %v1006_v2 = vld [vmem:[%s1366_s29 + $0x20] sm:$0xff]  ;;  %v1007_v3 = vld [vmem:[%s1366_s29 + $0x28] sm:$0xff]  ;;  %v1012_v12 = vld [vmem:[%s1366_s29 + $0x10] sm:$0xff]  ;;  %s134_s25 = scalar_lea.vmem [#allocation5], %s1005_s16  ;;  %s1531_s2 = scalar_lea.hbm %s1577_s1, %s1107_s24 }
  0x37   : > { %v1008_v4 = vld [vmem:[%s1366_s29 + $0x40] sm:$0xff]  ;;  %v1009_v5 = vld [vmem:[%s1366_s29 + $0x48] sm:$0xff]  ;;  %v146_v6 = vmax.f32 %v135_v0, %v1006_v2  ;;  %v147_v9 = vmax.f32 %v136_v1, %v1007_v3  ;;  %v1380_v10 = vmin.f32 %v135_v0, %v1006_v2  ;;  %v1382_v11 = vmin.f32 %v136_v1, %v1007_v3  ;;  %v1013_v17 = vld [vmem:[%s1366_s29 + $0x18] sm:$0xff]  ;;  %s927_s27 = sshll.u32 %s134_s25, 4  ;;  %s914_s3 = scalar_lea.sflag [#allocation4], %s1362_s22  ;;  %s1533_s27 = int_to_ptr.vmem [resolvable:$true] %s927_s27 }
  0x38   : > { %v1010_v7 = vld [vmem:[%s1366_s29 + $0x60] sm:$0xff]  ;;  %v1011_v8 = vld [vmem:[%s1366_s29 + $0x68] sm:$0xff]  ;;  %v1014_v18 = vld [vmem:[%s1366_s29 + $0x30] sm:$0xff]  ;;  %s1189_s10 = scalar_lea.vmem %s1533_s27, 256  ;;  %p1585_p12 = scmp.ne.s32.totalorder %s1581_s17, 0 }
  0x39   : > { %v150_v13 = vmax.f32 %v1008_v4, %v1010_v7  ;;  %v151_v14 = vmax.f32 %v1009_v5, %v1011_v8  ;;  %v1385_v15 = vmin.f32 %v1008_v4, %v1010_v7  ;;  %v1387_v16 = vmin.f32 %v1009_v5, %v1011_v8  ;;  %v1015_v19 = vld [vmem:[%s1366_s29 + $0x38] sm:$0xff]  ;;  %v1016_v20 = vld [vmem:[%s1366_s29 + $0x50] sm:$0xff]  ;;  %v1020_v38 = vld [vmem:[%s1366_s29 + $0x80] sm:$0xff]  ;;  %p1190_p11 = scmp.ne.s32.totalorder %s1533_s27, %s1189_s10  ;;  %s1258_s4 = smov [#allocation5]  }
  0x3a   : > { %v1017_v21 = vld [vmem:[%s1366_s29 + $0x58] sm:$0xff]  ;;  %v1018_v22 = vld [vmem:[%s1366_s29 + $0x70] sm:$0xff]  ;;  %v178_v23 = vmax.f32 %v1012_v12, %v1014_v18  ;;  %v179_v24 = vmax.f32 %v1013_v17, %v1015_v19  ;;  %v1396_v28 = vmin.f32 %v1012_v12, %v1014_v18  ;;  %v1398_v29 = vmin.f32 %v1013_v17, %v1015_v19  ;;  %v1021_v39 = vld [vmem:[%s1366_s29 + $0x88] sm:$0xff]  ;;  %s1193_s5 = sshll.u32 %s1258_s4, 4  ;;  %s1194_s5 = int_to_ptr.vmem [resolvable:$false] %s1193_s5 }
  0x3b   : > { %v156_v25 = vmin.f32 %v146_v6, %v150_v13  ;;  %v157_v26 = vmin.f32 %v147_v9, %v151_v14  ;;  %v1019_v27 = vld [vmem:[%s1366_s29 + $0x78] sm:$0xff]  ;;  %v154_v30 = vmax.f32 %v146_v6, %v150_v13  ;;  %v155_v31 = vmax.f32 %v147_v9, %v151_v14  ;;  %v1022_v52 = vld [vmem:[%s1366_s29 + $0x90] sm:$0xff]  ;;  %p1191_p13 = pnand %p1190_p11, %p1585_p12  ;;  %s1195_s11 = scalar_lea.vmem %s1194_s5, 512 }
  0x3c   : > { %v158_v32 = vmax.f32 %v1380_v10, %v1385_v15  ;;  %v159_v33 = vmax.f32 %v1382_v11, %v1387_v16  ;;  %v182_v34 = vmax.f32 %v1016_v20, %v1018_v22  ;;  %v183_v35 = vmax.f32 %v1017_v21, %v1019_v27  ;;  %v1023_v53 = vld [vmem:[%s1366_s29 + $0x98] sm:$0xff]  ;;  %p1196_p5 = scmp.lt.s32.totalorder %s1533_s27, %s1194_s5  ;;  %p1197_p7 = scmp.lt.s32.totalorder %s1195_s11, %s1189_s10 }
  0x3d   : > { %v1404_v36 = vmin.f32 %v1016_v20, %v1018_v22  ;;  %v1406_v37 = vmin.f32 %v1017_v21, %v1019_v27  ;;  %v203_v50 = vmin.f32 %v154_v30, %v1020_v38  ;;  %v204_v51 = vmin.f32 %v155_v31, %v1021_v39  ;;  %v1027_v17 = vld [vmem:[%s1366_s29 + $0xb8] sm:$0xff]  ;;  %p1192_p4 = pneg %p1191_p13 }
  0x3e   : > { %v162_v40 = vmax.f32 %v156_v25, %v158_v32  ;;  %v163_v41 = vmax.f32 %v157_v26, %v159_v33  ;;  %v188_v42 = vmin.f32 %v178_v23, %v182_v34  ;;  %v189_v43 = vmin.f32 %v179_v24, %v183_v35  ;;  %p1198_p8 = por %p1197_p7, %p1196_p5 }
  0x3f   : > { %v186_v44 = vmax.f32 %v178_v23, %v182_v34  ;;  %v187_v45 = vmax.f32 %v179_v24, %v183_v35  ;;  %v190_v46 = vmax.f32 %v1396_v28, %v1404_v36  ;;  %v191_v47 = vmax.f32 %v1398_v29, %v1406_v37 }
  0x40   : > { %v164_v48 = vmin.f32 %v156_v25, %v158_v32  ;;  %v165_v49 = vmin.f32 %v157_v26, %v159_v33  ;;  %v160_v54 = vmin.f32 %v1380_v10, %v1385_v15  ;;  %v161_v55 = vmin.f32 %v1382_v11, %v1387_v16  ;;  %v1024_v10 = vld [vmem:[%s1366_s29 + $0xa0] sm:$0xff]  ;;  %v1025_v11 = vld [vmem:[%s1366_s29 + $0xa8] sm:$0xff]  ;;  %v1026_v16 = vld [vmem:[%s1366_s29 + $0xb0] sm:$0xff]  ;;  %p1199_p10 = pnand %p1198_p8, %p1192_p4 }
  0x41   : > { %v194_v56 = vmax.f32 %v188_v42, %v190_v46  ;;  %v195_v57 = vmax.f32 %v189_v43, %v191_v47  ;;  %v192_v58 = vmin.f32 %v1396_v28, %v1404_v36  ;;  %v193_v59 = vmin.f32 %v1398_v29, %v1406_v37 }
  0x42   : > { %v207_v60 = vmin.f32 %v162_v40, %v203_v50  ;;  %v208_v61 = vmin.f32 %v163_v41, %v204_v51  ;;  %v201_v62 = vmax.f32 %v154_v30, %v1020_v38  ;;  %v202_v63 = vmax.f32 %v155_v31, %v1021_v39 }
  0x43   : > { %v220_v0 = vmin.f32 %v186_v44, %v1022_v52  ;;  %v221_v1 = vmin.f32 %v187_v45, %v1023_v53  ;;  %v196_v2 = vmin.f32 %v188_v42, %v190_v46  ;;  %v197_v3 = vmin.f32 %v189_v43, %v191_v47  ;;  %v1028_v42 = vld [vmem:[%s1366_s29 + $0xc0] sm:$0xff]  ;;  %v1029_v43 = vld [vmem:[%s1366_s29 + $0xc8] sm:$0xff] }
  0x44   : > { %v211_v4 = vmin.f32 %v164_v48, %v207_v60  ;;  %v212_v5 = vmin.f32 %v165_v49, %v208_v61  ;;  %v218_v6 = vmax.f32 %v186_v44, %v1022_v52  ;;  %v219_v7 = vmax.f32 %v187_v45, %v1023_v53 }
  0x45   : > { %v224_v8 = vmin.f32 %v194_v56, %v220_v0  ;;  %v225_v9 = vmin.f32 %v195_v57, %v221_v1  ;;  %v205_v12 = vmax.f32 %v162_v40, %v203_v50  ;;  %v206_v13 = vmax.f32 %v163_v41, %v204_v51 }
  0x46   : > { %v209_v14 = vmax.f32 %v164_v48, %v207_v60  ;;  %v210_v15 = vmax.f32 %v165_v49, %v208_v61  ;;  %v213_v18 = vmax.f32 %v160_v54, %v211_v4  ;;  %v214_v19 = vmax.f32 %v161_v55, %v212_v5  ;;  %v1030_v48 = vld [vmem:[%s1366_s29 + $0xd0] sm:$0xff]  ;;  %v1031_v49 = vld [vmem:[%s1366_s29 + $0xd8] sm:$0xff] }
  0x47   : > { %v222_v20 = vmax.f32 %v194_v56, %v220_v0  ;;  %v223_v21 = vmax.f32 %v195_v57, %v221_v1  ;;  %v228_v22 = vmin.f32 %v196_v2, %v224_v8  ;;  %v229_v23 = vmin.f32 %v197_v3, %v225_v9 }
  0x48   : > { %v237_v24 = vmin.f32 %v201_v62, %v1024_v10  ;;  %v238_v25 = vmin.f32 %v202_v63, %v1025_v11  ;;  %v235_v26 = vmax.f32 %v201_v62, %v1024_v10  ;;  %v236_v27 = vmax.f32 %v202_v63, %v1025_v11  ;;  %v1032_v10 = vld [vmem:[%s1366_s29 + $0xe0] sm:$0xff]  ;;  %v1033_v11 = vld [vmem:[%s1366_s29 + $0xe8] sm:$0xff] }
  0x49   : > { %v254_v28 = vmin.f32 %v218_v6, %v1026_v16  ;;  %v255_v29 = vmin.f32 %v219_v7, %v1027_v17  ;;  %v226_v30 = vmax.f32 %v196_v2, %v224_v8  ;;  %v227_v31 = vmax.f32 %v197_v3, %v225_v9 }
  0x4a   : > { %v241_v32 = vmin.f32 %v205_v12, %v237_v24  ;;  %v242_v33 = vmin.f32 %v206_v13, %v238_v25  ;;  %v252_v34 = vmax.f32 %v218_v6, %v1026_v16  ;;  %v253_v35 = vmax.f32 %v219_v7, %v1027_v17  ;;  %v1034_v16 = vld [vmem:[%s1366_s29 + $0xf0] sm:$0xff]  ;;  %v1035_v17 = vld [vmem:[%s1366_s29 + $0xf8] sm:$0xff] }
  0x4b   : > { %v258_v36 = vmin.f32 %v222_v20, %v254_v28  ;;  %v259_v37 = vmin.f32 %v223_v21, %v255_v29  ;;  %v230_v38 = vmax.f32 %v192_v58, %v228_v22  ;;  %v231_v39 = vmax.f32 %v193_v59, %v229_v23 }
  0x4c   : > { %v245_v40 = vmin.f32 %v209_v14, %v241_v32  ;;  %v246_v41 = vmin.f32 %v210_v15, %v242_v33  ;;  %v239_v44 = vmax.f32 %v205_v12, %v237_v24  ;;  %v240_v45 = vmax.f32 %v206_v13, %v238_v25 }
  0x4d   : > { %v256_v46 = vmax.f32 %v222_v20, %v254_v28  ;;  %v257_v47 = vmax.f32 %v223_v21, %v255_v29  ;;  %v243_v50 = vmax.f32 %v209_v14, %v241_v32  ;;  %v244_v51 = vmax.f32 %v210_v15, %v242_v33 }
  0x4e   : > { %v262_v52 = vmin.f32 %v226_v30, %v258_v36  ;;  %v263_v53 = vmin.f32 %v227_v31, %v259_v37  ;;  %v260_v54 = vmax.f32 %v226_v30, %v258_v36  ;;  %v261_v55 = vmax.f32 %v227_v31, %v259_v37 }
  0x4f   : > { %v271_v56 = vmin.f32 %v235_v26, %v1028_v42  ;;  %v272_v57 = vmin.f32 %v236_v27, %v1029_v43  ;;  %v247_v58 = vmax.f32 %v213_v18, %v245_v40  ;;  %v248_v59 = vmax.f32 %v214_v19, %v246_v41 }
  0x50   : > { %v288_v60 = vmin.f32 %v252_v34, %v1030_v48  ;;  %v289_v61 = vmin.f32 %v253_v35, %v1031_v49  ;;  %v269_v62 = vmax.f32 %v235_v26, %v1028_v42  ;;  %v270_v63 = vmax.f32 %v236_v27, %v1029_v43  ;;  %v1036_v42 = vld [vmem:[%s1366_s29 + $0x100] sm:$0xff]  ;;  %v1037_v43 = vld [vmem:[%s1366_s29 + $0x108] sm:$0xff] }
  0x51   : > { %v275_v0 = vmin.f32 %v239_v44, %v271_v56  ;;  %v276_v1 = vmin.f32 %v240_v45, %v272_v57  ;;  %v264_v2 = vmax.f32 %v230_v38, %v262_v52  ;;  %v265_v3 = vmax.f32 %v231_v39, %v263_v53 }
  0x52   : > { %v292_v4 = vmin.f32 %v256_v46, %v288_v60  ;;  %v293_v5 = vmin.f32 %v257_v47, %v289_v61  ;;  %v286_v8 = vmax.f32 %v252_v34, %v1030_v48  ;;  %v287_v9 = vmax.f32 %v253_v35, %v1031_v49  ;;  %v1038_v48 = vld [vmem:[%s1366_s29 + $0x110] sm:$0xff]  ;;  %v1039_v49 = vld [vmem:[%s1366_s29 + $0x118] sm:$0xff] }
  0x53   : > { %v279_v6 = vmin.f32 %v243_v50, %v275_v0  ;;  %v280_v7 = vmin.f32 %v244_v51, %v276_v1  ;;  %v273_v12 = vmax.f32 %v239_v44, %v271_v56  ;;  %v274_v13 = vmax.f32 %v240_v45, %v272_v57 }
  0x54   : > { %v290_v14 = vmax.f32 %v256_v46, %v288_v60  ;;  %v291_v15 = vmax.f32 %v257_v47, %v289_v61  ;;  %v277_v18 = vmax.f32 %v243_v50, %v275_v0  ;;  %v278_v19 = vmax.f32 %v244_v51, %v276_v1 }
  0x55   : > { %v296_v20 = vmin.f32 %v260_v54, %v292_v4  ;;  %v297_v21 = vmin.f32 %v261_v55, %v293_v5  ;;  %v294_v22 = vmax.f32 %v260_v54, %v292_v4  ;;  %v295_v23 = vmax.f32 %v261_v55, %v293_v5 }
  0x56   : > { %v305_v24 = vmin.f32 %v269_v62, %v1032_v10  ;;  %v306_v25 = vmin.f32 %v270_v63, %v1033_v11  ;;  %v281_v26 = vmax.f32 %v247_v58, %v279_v6  ;;  %v282_v27 = vmax.f32 %v248_v59, %v280_v7 }
  0x57   : > { %v322_v28 = vmin.f32 %v286_v8, %v1034_v16  ;;  %v323_v29 = vmin.f32 %v287_v9, %v1035_v17  ;;  %v303_v30 = vmax.f32 %v269_v62, %v1032_v10  ;;  %v304_v31 = vmax.f32 %v270_v63, %v1033_v11  ;;  %v1040_v10 = vld [vmem:[%s1366_s29 + $0x120] sm:$0xff]  ;;  %v1041_v11 = vld [vmem:[%s1366_s29 + $0x128] sm:$0xff] }
  0x58   : > { %v309_v32 = vmin.f32 %v273_v12, %v305_v24  ;;  %v310_v33 = vmin.f32 %v274_v13, %v306_v25  ;;  %v298_v34 = vmax.f32 %v264_v2, %v296_v20  ;;  %v299_v35 = vmax.f32 %v265_v3, %v297_v21 }
  0x59   : > { %v326_v36 = vmin.f32 %v290_v14, %v322_v28  ;;  %v327_v37 = vmin.f32 %v291_v15, %v323_v29  ;;  %v320_v40 = vmax.f32 %v286_v8, %v1034_v16  ;;  %v321_v41 = vmax.f32 %v287_v9, %v1035_v17  ;;  %v1042_v16 = vld [vmem:[%s1366_s29 + $0x130] sm:$0xff]  ;;  %v1043_v17 = vld [vmem:[%s1366_s29 + $0x138] sm:$0xff] }
  0x5a   : > { %v313_v38 = vmin.f32 %v277_v18, %v309_v32  ;;  %v314_v39 = vmin.f32 %v278_v19, %v310_v33  ;;  %v307_v44 = vmax.f32 %v273_v12, %v305_v24  ;;  %v308_v45 = vmax.f32 %v274_v13, %v306_v25 }
  0x5b   : > { %v324_v46 = vmax.f32 %v290_v14, %v322_v28  ;;  %v325_v47 = vmax.f32 %v291_v15, %v323_v29  ;;  %v311_v50 = vmax.f32 %v277_v18, %v309_v32  ;;  %v312_v51 = vmax.f32 %v278_v19, %v310_v33 }
  0x5c   : > { %v330_v52 = vmin.f32 %v294_v22, %v326_v36  ;;  %v331_v53 = vmin.f32 %v295_v23, %v327_v37  ;;  %v328_v54 = vmax.f32 %v294_v22, %v326_v36  ;;  %v329_v55 = vmax.f32 %v295_v23, %v327_v37 }
  0x5d   : > { %v339_v56 = vmin.f32 %v303_v30, %v1036_v42  ;;  %v340_v57 = vmin.f32 %v304_v31, %v1037_v43  ;;  %v315_v58 = vmax.f32 %v281_v26, %v313_v38  ;;  %v316_v59 = vmax.f32 %v282_v27, %v314_v39 }
  0x5e   : > { %v356_v60 = vmin.f32 %v320_v40, %v1038_v48  ;;  %v357_v61 = vmin.f32 %v321_v41, %v1039_v49  ;;  %v337_v62 = vmax.f32 %v303_v30, %v1036_v42  ;;  %v338_v63 = vmax.f32 %v304_v31, %v1037_v43  ;;  %v1044_v42 = vld [vmem:[%s1366_s29 + $0x140] sm:$0xff]  ;;  %v1045_v43 = vld [vmem:[%s1366_s29 + $0x148] sm:$0xff] }
  0x5f   : > { %v343_v0 = vmin.f32 %v307_v44, %v339_v56  ;;  %v344_v1 = vmin.f32 %v308_v45, %v340_v57  ;;  %v332_v2 = vmax.f32 %v298_v34, %v330_v52  ;;  %v333_v3 = vmax.f32 %v299_v35, %v331_v53 }
  0x60   : > { %v360_v4 = vmin.f32 %v324_v46, %v356_v60  ;;  %v361_v5 = vmin.f32 %v325_v47, %v357_v61  ;;  %v354_v8 = vmax.f32 %v320_v40, %v1038_v48  ;;  %v355_v9 = vmax.f32 %v321_v41, %v1039_v49  ;;  %v1046_v48 = vld [vmem:[%s1366_s29 + $0x150] sm:$0xff]  ;;  %v1047_v49 = vld [vmem:[%s1366_s29 + $0x158] sm:$0xff] }
  0x61   : > { %v347_v6 = vmin.f32 %v311_v50, %v343_v0  ;;  %v348_v7 = vmin.f32 %v312_v51, %v344_v1  ;;  %v341_v12 = vmax.f32 %v307_v44, %v339_v56  ;;  %v342_v13 = vmax.f32 %v308_v45, %v340_v57 }
  0x62   : > { %v358_v14 = vmax.f32 %v324_v46, %v356_v60  ;;  %v359_v15 = vmax.f32 %v325_v47, %v357_v61  ;;  %v345_v18 = vmax.f32 %v311_v50, %v343_v0  ;;  %v346_v19 = vmax.f32 %v312_v51, %v344_v1 }
  0x63   : > { %v364_v20 = vmin.f32 %v328_v54, %v360_v4  ;;  %v365_v21 = vmin.f32 %v329_v55, %v361_v5  ;;  %v362_v22 = vmax.f32 %v328_v54, %v360_v4  ;;  %v363_v23 = vmax.f32 %v329_v55, %v361_v5 }
  0x64   : > { %v373_v24 = vmin.f32 %v337_v62, %v1040_v10  ;;  %v374_v25 = vmin.f32 %v338_v63, %v1041_v11  ;;  %v349_v26 = vmax.f32 %v315_v58, %v347_v6  ;;  %v350_v27 = vmax.f32 %v316_v59, %v348_v7 }
  0x65   : > { %v390_v28 = vmin.f32 %v354_v8, %v1042_v16  ;;  %v391_v29 = vmin.f32 %v355_v9, %v1043_v17  ;;  %v371_v30 = vmax.f32 %v337_v62, %v1040_v10  ;;  %v372_v31 = vmax.f32 %v338_v63, %v1041_v11  ;;  %v1048_v10 = vld [vmem:[%s1366_s29 + $0x160] sm:$0xff]  ;;  %v1049_v11 = vld [vmem:[%s1366_s29 + $0x168] sm:$0xff] }
  0x66   : > { %v377_v32 = vmin.f32 %v341_v12, %v373_v24  ;;  %v378_v33 = vmin.f32 %v342_v13, %v374_v25  ;;  %v366_v34 = vmax.f32 %v332_v2, %v364_v20  ;;  %v367_v35 = vmax.f32 %v333_v3, %v365_v21 }
  0x67   : > { %v394_v36 = vmin.f32 %v358_v14, %v390_v28  ;;  %v395_v37 = vmin.f32 %v359_v15, %v391_v29  ;;  %v388_v40 = vmax.f32 %v354_v8, %v1042_v16  ;;  %v389_v41 = vmax.f32 %v355_v9, %v1043_v17  ;;  %v1050_v16 = vld [vmem:[%s1366_s29 + $0x170] sm:$0xff]  ;;  %v1051_v17 = vld [vmem:[%s1366_s29 + $0x178] sm:$0xff] }
  0x68   : > { %v381_v38 = vmin.f32 %v345_v18, %v377_v32  ;;  %v382_v39 = vmin.f32 %v346_v19, %v378_v33  ;;  %v375_v44 = vmax.f32 %v341_v12, %v373_v24  ;;  %v376_v45 = vmax.f32 %v342_v13, %v374_v25 }
  0x69   : > { %v392_v46 = vmax.f32 %v358_v14, %v390_v28  ;;  %v393_v47 = vmax.f32 %v359_v15, %v391_v29  ;;  %v379_v50 = vmax.f32 %v345_v18, %v377_v32  ;;  %v380_v51 = vmax.f32 %v346_v19, %v378_v33 }
  0x6a   : > { %v398_v52 = vmin.f32 %v362_v22, %v394_v36  ;;  %v399_v53 = vmin.f32 %v363_v23, %v395_v37  ;;  %v396_v54 = vmax.f32 %v362_v22, %v394_v36  ;;  %v397_v55 = vmax.f32 %v363_v23, %v395_v37 }
  0x6b   : > { %v407_v56 = vmin.f32 %v371_v30, %v1044_v42  ;;  %v408_v57 = vmin.f32 %v372_v31, %v1045_v43  ;;  %v383_v58 = vmax.f32 %v349_v26, %v381_v38  ;;  %v384_v59 = vmax.f32 %v350_v27, %v382_v39 }
  0x6c   : > { %v424_v60 = vmin.f32 %v388_v40, %v1046_v48  ;;  %v425_v61 = vmin.f32 %v389_v41, %v1047_v49  ;;  %v405_v62 = vmax.f32 %v371_v30, %v1044_v42  ;;  %v406_v63 = vmax.f32 %v372_v31, %v1045_v43  ;;  %v1052_v42 = vld [vmem:[%s1366_s29 + $0x180] sm:$0xff]  ;;  %v1053_v43 = vld [vmem:[%s1366_s29 + $0x188] sm:$0xff] }
  0x6d   : > { %v411_v0 = vmin.f32 %v375_v44, %v407_v56  ;;  %v412_v1 = vmin.f32 %v376_v45, %v408_v57  ;;  %v400_v2 = vmax.f32 %v366_v34, %v398_v52  ;;  %v401_v3 = vmax.f32 %v367_v35, %v399_v53 }
  0x6e   : > { %v428_v4 = vmin.f32 %v392_v46, %v424_v60  ;;  %v429_v5 = vmin.f32 %v393_v47, %v425_v61  ;;  %v422_v8 = vmax.f32 %v388_v40, %v1046_v48  ;;  %v423_v9 = vmax.f32 %v389_v41, %v1047_v49  ;;  %v1054_v48 = vld [vmem:[%s1366_s29 + $0x190] sm:$0xff]  ;;  %v1055_v49 = vld [vmem:[%s1366_s29 + $0x198] sm:$0xff] }
  0x6f   : > { %v415_v6 = vmin.f32 %v379_v50, %v411_v0  ;;  %v416_v7 = vmin.f32 %v380_v51, %v412_v1  ;;  %v409_v12 = vmax.f32 %v375_v44, %v407_v56  ;;  %v410_v13 = vmax.f32 %v376_v45, %v408_v57 }
  0x70   : > { %v426_v14 = vmax.f32 %v392_v46, %v424_v60  ;;  %v427_v15 = vmax.f32 %v393_v47, %v425_v61  ;;  %v413_v18 = vmax.f32 %v379_v50, %v411_v0  ;;  %v414_v19 = vmax.f32 %v380_v51, %v412_v1 }
  0x71   : > { %v432_v20 = vmin.f32 %v396_v54, %v428_v4  ;;  %v433_v21 = vmin.f32 %v397_v55, %v429_v5  ;;  %v430_v22 = vmax.f32 %v396_v54, %v428_v4  ;;  %v431_v23 = vmax.f32 %v397_v55, %v429_v5 }
  0x72   : > { %v441_v24 = vmin.f32 %v405_v62, %v1048_v10  ;;  %v442_v25 = vmin.f32 %v406_v63, %v1049_v11  ;;  %v417_v26 = vmax.f32 %v383_v58, %v415_v6  ;;  %v418_v27 = vmax.f32 %v384_v59, %v416_v7 }
  0x73   : > { %v458_v28 = vmin.f32 %v422_v8, %v1050_v16  ;;  %v459_v29 = vmin.f32 %v423_v9, %v1051_v17  ;;  %v439_v30 = vmax.f32 %v405_v62, %v1048_v10  ;;  %v440_v31 = vmax.f32 %v406_v63, %v1049_v11  ;;  %v1056_v10 = vld [vmem:[%s1366_s29 + $0x1a0] sm:$0xff]  ;;  %v1057_v11 = vld [vmem:[%s1366_s29 + $0x1a8] sm:$0xff] }
  0x74   : > { %v445_v32 = vmin.f32 %v409_v12, %v441_v24  ;;  %v446_v33 = vmin.f32 %v410_v13, %v442_v25  ;;  %v434_v34 = vmax.f32 %v400_v2, %v432_v20  ;;  %v435_v35 = vmax.f32 %v401_v3, %v433_v21 }
  0x75   : > { %v462_v36 = vmin.f32 %v426_v14, %v458_v28  ;;  %v463_v37 = vmin.f32 %v427_v15, %v459_v29  ;;  %v456_v40 = vmax.f32 %v422_v8, %v1050_v16  ;;  %v457_v41 = vmax.f32 %v423_v9, %v1051_v17  ;;  %v1058_v16 = vld [vmem:[%s1366_s29 + $0x1b0] sm:$0xff]  ;;  %v1059_v17 = vld [vmem:[%s1366_s29 + $0x1b8] sm:$0xff] }
  0x76   : > { %v449_v38 = vmin.f32 %v413_v18, %v445_v32  ;;  %v450_v39 = vmin.f32 %v414_v19, %v446_v33  ;;  %v443_v44 = vmax.f32 %v409_v12, %v441_v24  ;;  %v444_v45 = vmax.f32 %v410_v13, %v442_v25 }
  0x77   : > { %v460_v46 = vmax.f32 %v426_v14, %v458_v28  ;;  %v461_v47 = vmax.f32 %v427_v15, %v459_v29  ;;  %v447_v50 = vmax.f32 %v413_v18, %v445_v32  ;;  %v448_v51 = vmax.f32 %v414_v19, %v446_v33 }
  0x78   : > { %v466_v52 = vmin.f32 %v430_v22, %v462_v36  ;;  %v467_v53 = vmin.f32 %v431_v23, %v463_v37  ;;  %v464_v54 = vmax.f32 %v430_v22, %v462_v36  ;;  %v465_v55 = vmax.f32 %v431_v23, %v463_v37 }
  0x79   : > { %v475_v56 = vmin.f32 %v439_v30, %v1052_v42  ;;  %v476_v57 = vmin.f32 %v440_v31, %v1053_v43  ;;  %v451_v58 = vmax.f32 %v417_v26, %v449_v38  ;;  %v452_v59 = vmax.f32 %v418_v27, %v450_v39 }
  0x7a   : > { %v492_v60 = vmin.f32 %v456_v40, %v1054_v48  ;;  %v493_v61 = vmin.f32 %v457_v41, %v1055_v49  ;;  %v473_v62 = vmax.f32 %v439_v30, %v1052_v42  ;;  %v474_v63 = vmax.f32 %v440_v31, %v1053_v43  ;;  %v1060_v42 = vld [vmem:[%s1366_s29 + $0x1c0] sm:$0xff]  ;;  %v1061_v43 = vld [vmem:[%s1366_s29 + $0x1c8] sm:$0xff] }
  0x7b   : > { %v479_v0 = vmin.f32 %v443_v44, %v475_v56  ;;  %v480_v1 = vmin.f32 %v444_v45, %v476_v57  ;;  %v468_v2 = vmax.f32 %v434_v34, %v466_v52  ;;  %v469_v3 = vmax.f32 %v435_v35, %v467_v53 }
  0x7c   : > { %v496_v4 = vmin.f32 %v460_v46, %v492_v60  ;;  %v497_v5 = vmin.f32 %v461_v47, %v493_v61  ;;  %v490_v8 = vmax.f32 %v456_v40, %v1054_v48  ;;  %v491_v9 = vmax.f32 %v457_v41, %v1055_v49  ;;  %v1062_v48 = vld [vmem:[%s1366_s29 + $0x1d0] sm:$0xff]  ;;  %v1063_v49 = vld [vmem:[%s1366_s29 + $0x1d8] sm:$0xff] }
  0x7d   : > { %v483_v6 = vmin.f32 %v447_v50, %v479_v0  ;;  %v484_v7 = vmin.f32 %v448_v51, %v480_v1  ;;  %v477_v12 = vmax.f32 %v443_v44, %v475_v56  ;;  %v478_v13 = vmax.f32 %v444_v45, %v476_v57 }
  0x7e   : > { %v494_v14 = vmax.f32 %v460_v46, %v492_v60  ;;  %v495_v15 = vmax.f32 %v461_v47, %v493_v61  ;;  %v481_v18 = vmax.f32 %v447_v50, %v479_v0  ;;  %v482_v19 = vmax.f32 %v448_v51, %v480_v1 }
  0x7f   : > { %v500_v20 = vmin.f32 %v464_v54, %v496_v4  ;;  %v501_v21 = vmin.f32 %v465_v55, %v497_v5  ;;  %v498_v22 = vmax.f32 %v464_v54, %v496_v4  ;;  %v499_v23 = vmax.f32 %v465_v55, %v497_v5 }
  0x80   : > { %v509_v24 = vmin.f32 %v473_v62, %v1056_v10  ;;  %v510_v25 = vmin.f32 %v474_v63, %v1057_v11  ;;  %v485_v26 = vmax.f32 %v451_v58, %v483_v6  ;;  %v486_v27 = vmax.f32 %v452_v59, %v484_v7 }
  0x81   : > { %v526_v28 = vmin.f32 %v490_v8, %v1058_v16  ;;  %v527_v29 = vmin.f32 %v491_v9, %v1059_v17  ;;  %v507_v30 = vmax.f32 %v473_v62, %v1056_v10  ;;  %v508_v31 = vmax.f32 %v474_v63, %v1057_v11  ;;  %v1064_v10 = vld [vmem:[%s1366_s29 + $0x1e0] sm:$0xff]  ;;  %v1065_v11 = vld [vmem:[%s1366_s29 + $0x1e8] sm:$0xff] }
  0x82   : > { %v513_v32 = vmin.f32 %v477_v12, %v509_v24  ;;  %v514_v33 = vmin.f32 %v478_v13, %v510_v25  ;;  %v502_v34 = vmax.f32 %v468_v2, %v500_v20  ;;  %v503_v35 = vmax.f32 %v469_v3, %v501_v21 }
  0x83   : > { %v530_v36 = vmin.f32 %v494_v14, %v526_v28  ;;  %v531_v37 = vmin.f32 %v495_v15, %v527_v29  ;;  %v524_v40 = vmax.f32 %v490_v8, %v1058_v16  ;;  %v525_v41 = vmax.f32 %v491_v9, %v1059_v17  ;;  %v1066_v16 = vld [vmem:[%s1366_s29 + $0x1f0] sm:$0xff]  ;;  %v1067_v17 = vld [vmem:[%s1366_s29 + $0x1f8] sm:$0xff] }
  0x84   : > { %v517_v38 = vmin.f32 %v481_v18, %v513_v32  ;;  %v518_v39 = vmin.f32 %v482_v19, %v514_v33  ;;  %v511_v44 = vmax.f32 %v477_v12, %v509_v24  ;;  %v512_v45 = vmax.f32 %v478_v13, %v510_v25 }
  0x85   : > { %v528_v46 = vmax.f32 %v494_v14, %v526_v28  ;;  %v529_v47 = vmax.f32 %v495_v15, %v527_v29  ;;  %v515_v50 = vmax.f32 %v481_v18, %v513_v32  ;;  %v516_v51 = vmax.f32 %v482_v19, %v514_v33 }
  0x86   : > { %v534_v52 = vmin.f32 %v498_v22, %v530_v36  ;;  %v535_v53 = vmin.f32 %v499_v23, %v531_v37  ;;  %v532_v54 = vmax.f32 %v498_v22, %v530_v36  ;;  %v533_v55 = vmax.f32 %v499_v23, %v531_v37 }
  0x87   : > { %v543_v56 = vmin.f32 %v507_v30, %v1060_v42  ;;  %v544_v57 = vmin.f32 %v508_v31, %v1061_v43  ;;  %v519_v58 = vmax.f32 %v485_v26, %v517_v38  ;;  %v520_v59 = vmax.f32 %v486_v27, %v518_v39 }
  0x88   : > { %v560_v60 = vmin.f32 %v524_v40, %v1062_v48  ;;  %v561_v61 = vmin.f32 %v525_v41, %v1063_v49  ;;  %v541_v62 = vmax.f32 %v507_v30, %v1060_v42  ;;  %v542_v63 = vmax.f32 %v508_v31, %v1061_v43  ;;  %v1068_v42 = vld [vmem:[%s1366_s29 + $0x200] sm:$0xff]  ;;  %v1069_v43 = vld [vmem:[%s1366_s29 + $0x208] sm:$0xff] }
  0x89   : > { %v547_v0 = vmin.f32 %v511_v44, %v543_v56  ;;  %v548_v1 = vmin.f32 %v512_v45, %v544_v57  ;;  %v536_v2 = vmax.f32 %v502_v34, %v534_v52  ;;  %v537_v3 = vmax.f32 %v503_v35, %v535_v53 }
  0x8a   : > { %v564_v4 = vmin.f32 %v528_v46, %v560_v60  ;;  %v565_v5 = vmin.f32 %v529_v47, %v561_v61  ;;  %v558_v8 = vmax.f32 %v524_v40, %v1062_v48  ;;  %v559_v9 = vmax.f32 %v525_v41, %v1063_v49  ;;  %v1070_v48 = vld [vmem:[%s1366_s29 + $0x210] sm:$0xff]  ;;  %v1071_v49 = vld [vmem:[%s1366_s29 + $0x218] sm:$0xff] }
  0x8b   : > { %v551_v6 = vmin.f32 %v515_v50, %v547_v0  ;;  %v552_v7 = vmin.f32 %v516_v51, %v548_v1  ;;  %v545_v12 = vmax.f32 %v511_v44, %v543_v56  ;;  %v546_v13 = vmax.f32 %v512_v45, %v544_v57 }
  0x8c   : > { %v562_v14 = vmax.f32 %v528_v46, %v560_v60  ;;  %v563_v15 = vmax.f32 %v529_v47, %v561_v61  ;;  %v549_v18 = vmax.f32 %v515_v50, %v547_v0  ;;  %v550_v19 = vmax.f32 %v516_v51, %v548_v1 }
  0x8d   : > { %v568_v20 = vmin.f32 %v532_v54, %v564_v4  ;;  %v569_v21 = vmin.f32 %v533_v55, %v565_v5  ;;  %v566_v22 = vmax.f32 %v532_v54, %v564_v4  ;;  %v567_v23 = vmax.f32 %v533_v55, %v565_v5 }
  0x8e   : > { %v577_v24 = vmin.f32 %v541_v62, %v1064_v10  ;;  %v578_v25 = vmin.f32 %v542_v63, %v1065_v11  ;;  %v553_v26 = vmax.f32 %v519_v58, %v551_v6  ;;  %v554_v27 = vmax.f32 %v520_v59, %v552_v7 }
  0x8f   : > { %v594_v28 = vmin.f32 %v558_v8, %v1066_v16  ;;  %v595_v29 = vmin.f32 %v559_v9, %v1067_v17  ;;  %v575_v30 = vmax.f32 %v541_v62, %v1064_v10  ;;  %v576_v31 = vmax.f32 %v542_v63, %v1065_v11  ;;  %v1072_v10 = vld [vmem:[%s1366_s29 + $0x220] sm:$0xff]  ;;  %v1073_v11 = vld [vmem:[%s1366_s29 + $0x228] sm:$0xff] }
  0x90   : > { %v581_v32 = vmin.f32 %v545_v12, %v577_v24  ;;  %v582_v33 = vmin.f32 %v546_v13, %v578_v25  ;;  %v570_v34 = vmax.f32 %v536_v2, %v568_v20  ;;  %v571_v35 = vmax.f32 %v537_v3, %v569_v21 }
  0x91   : > { %v598_v36 = vmin.f32 %v562_v14, %v594_v28  ;;  %v599_v37 = vmin.f32 %v563_v15, %v595_v29  ;;  %v592_v40 = vmax.f32 %v558_v8, %v1066_v16  ;;  %v593_v41 = vmax.f32 %v559_v9, %v1067_v17  ;;  %v1074_v16 = vld [vmem:[%s1366_s29 + $0x230] sm:$0xff]  ;;  %v1075_v17 = vld [vmem:[%s1366_s29 + $0x238] sm:$0xff] }
  0x92   : > { %v585_v38 = vmin.f32 %v549_v18, %v581_v32  ;;  %v586_v39 = vmin.f32 %v550_v19, %v582_v33  ;;  %v579_v44 = vmax.f32 %v545_v12, %v577_v24  ;;  %v580_v45 = vmax.f32 %v546_v13, %v578_v25 }
  0x93   : > { %v596_v46 = vmax.f32 %v562_v14, %v594_v28  ;;  %v597_v47 = vmax.f32 %v563_v15, %v595_v29  ;;  %v583_v50 = vmax.f32 %v549_v18, %v581_v32  ;;  %v584_v51 = vmax.f32 %v550_v19, %v582_v33 }
  0x94   : > { %v602_v52 = vmin.f32 %v566_v22, %v598_v36  ;;  %v603_v53 = vmin.f32 %v567_v23, %v599_v37  ;;  %v600_v54 = vmax.f32 %v566_v22, %v598_v36  ;;  %v601_v55 = vmax.f32 %v567_v23, %v599_v37 }
  0x95   : > { %v611_v56 = vmin.f32 %v575_v30, %v1068_v42  ;;  %v612_v57 = vmin.f32 %v576_v31, %v1069_v43  ;;  %v587_v58 = vmax.f32 %v553_v26, %v585_v38  ;;  %v588_v59 = vmax.f32 %v554_v27, %v586_v39 }
  0x96   : > { %v628_v60 = vmin.f32 %v592_v40, %v1070_v48  ;;  %v629_v61 = vmin.f32 %v593_v41, %v1071_v49  ;;  %v609_v62 = vmax.f32 %v575_v30, %v1068_v42  ;;  %v610_v63 = vmax.f32 %v576_v31, %v1069_v43  ;;  %v1076_v42 = vld [vmem:[%s1366_s29 + $0x240] sm:$0xff]  ;;  %v1077_v43 = vld [vmem:[%s1366_s29 + $0x248] sm:$0xff] }
  0x97   : > { %v615_v0 = vmin.f32 %v579_v44, %v611_v56  ;;  %v616_v1 = vmin.f32 %v580_v45, %v612_v57  ;;  %v604_v2 = vmax.f32 %v570_v34, %v602_v52  ;;  %v605_v3 = vmax.f32 %v571_v35, %v603_v53 }
  0x98   : > { %v632_v4 = vmin.f32 %v596_v46, %v628_v60  ;;  %v633_v5 = vmin.f32 %v597_v47, %v629_v61  ;;  %v626_v8 = vmax.f32 %v592_v40, %v1070_v48  ;;  %v627_v9 = vmax.f32 %v593_v41, %v1071_v49  ;;  %v1078_v48 = vld [vmem:[%s1366_s29 + $0x250] sm:$0xff]  ;;  %v1079_v49 = vld [vmem:[%s1366_s29 + $0x258] sm:$0xff] }
  0x99   : > { %v619_v6 = vmin.f32 %v583_v50, %v615_v0  ;;  %v620_v7 = vmin.f32 %v584_v51, %v616_v1  ;;  %v613_v12 = vmax.f32 %v579_v44, %v611_v56  ;;  %v614_v13 = vmax.f32 %v580_v45, %v612_v57 }
  0x9a   : > { %v630_v14 = vmax.f32 %v596_v46, %v628_v60  ;;  %v631_v15 = vmax.f32 %v597_v47, %v629_v61  ;;  %v617_v18 = vmax.f32 %v583_v50, %v615_v0  ;;  %v618_v19 = vmax.f32 %v584_v51, %v616_v1 }
  0x9b   : > { %v636_v20 = vmin.f32 %v600_v54, %v632_v4  ;;  %v637_v21 = vmin.f32 %v601_v55, %v633_v5  ;;  %v634_v22 = vmax.f32 %v600_v54, %v632_v4  ;;  %v635_v23 = vmax.f32 %v601_v55, %v633_v5 }
  0x9c   : > { %v645_v24 = vmin.f32 %v609_v62, %v1072_v10  ;;  %v646_v25 = vmin.f32 %v610_v63, %v1073_v11  ;;  %v621_v26 = vmax.f32 %v587_v58, %v619_v6  ;;  %v622_v27 = vmax.f32 %v588_v59, %v620_v7 }
  0x9d   : > { %v662_v28 = vmin.f32 %v626_v8, %v1074_v16  ;;  %v663_v29 = vmin.f32 %v627_v9, %v1075_v17  ;;  %v643_v30 = vmax.f32 %v609_v62, %v1072_v10  ;;  %v644_v31 = vmax.f32 %v610_v63, %v1073_v11  ;;  %v1080_v10 = vld [vmem:[%s1366_s29 + $0x260] sm:$0xff]  ;;  %v1081_v11 = vld [vmem:[%s1366_s29 + $0x268] sm:$0xff] }
  0x9e   : > { %v649_v32 = vmin.f32 %v613_v12, %v645_v24  ;;  %v650_v33 = vmin.f32 %v614_v13, %v646_v25  ;;  %v638_v34 = vmax.f32 %v604_v2, %v636_v20  ;;  %v639_v35 = vmax.f32 %v605_v3, %v637_v21 }
  0x9f   : > { %v666_v36 = vmin.f32 %v630_v14, %v662_v28  ;;  %v667_v37 = vmin.f32 %v631_v15, %v663_v29  ;;  %v660_v40 = vmax.f32 %v626_v8, %v1074_v16  ;;  %v661_v41 = vmax.f32 %v627_v9, %v1075_v17  ;;  %v1082_v16 = vld [vmem:[%s1366_s29 + $0x270] sm:$0xff]  ;;  %v1083_v17 = vld [vmem:[%s1366_s29 + $0x278] sm:$0xff] }
  0xa0   : > { %v653_v38 = vmin.f32 %v617_v18, %v649_v32  ;;  %v654_v39 = vmin.f32 %v618_v19, %v650_v33  ;;  %v647_v44 = vmax.f32 %v613_v12, %v645_v24  ;;  %v648_v45 = vmax.f32 %v614_v13, %v646_v25 }
  0xa1   : > { %v664_v46 = vmax.f32 %v630_v14, %v662_v28  ;;  %v665_v47 = vmax.f32 %v631_v15, %v663_v29  ;;  %v651_v50 = vmax.f32 %v617_v18, %v649_v32  ;;  %v652_v51 = vmax.f32 %v618_v19, %v650_v33 }
  0xa2   : > { %v670_v52 = vmin.f32 %v634_v22, %v666_v36  ;;  %v671_v53 = vmin.f32 %v635_v23, %v667_v37  ;;  %v668_v54 = vmax.f32 %v634_v22, %v666_v36  ;;  %v669_v55 = vmax.f32 %v635_v23, %v667_v37 }
  0xa3   : > { %v679_v56 = vmin.f32 %v643_v30, %v1076_v42  ;;  %v680_v57 = vmin.f32 %v644_v31, %v1077_v43  ;;  %v655_v58 = vmax.f32 %v621_v26, %v653_v38  ;;  %v656_v59 = vmax.f32 %v622_v27, %v654_v39 }
  0xa4   : > { %v696_v60 = vmin.f32 %v660_v40, %v1078_v48  ;;  %v697_v61 = vmin.f32 %v661_v41, %v1079_v49  ;;  %v677_v62 = vmax.f32 %v643_v30, %v1076_v42  ;;  %v678_v63 = vmax.f32 %v644_v31, %v1077_v43  ;;  %v1084_v42 = vld [vmem:[%s1366_s29 + $0x280] sm:$0xff]  ;;  %v1085_v43 = vld [vmem:[%s1366_s29 + $0x288] sm:$0xff] }
  0xa5   : > { %v683_v0 = vmin.f32 %v647_v44, %v679_v56  ;;  %v684_v1 = vmin.f32 %v648_v45, %v680_v57  ;;  %v672_v2 = vmax.f32 %v638_v34, %v670_v52  ;;  %v673_v3 = vmax.f32 %v639_v35, %v671_v53 }
  0xa6   : > { %v700_v4 = vmin.f32 %v664_v46, %v696_v60  ;;  %v701_v5 = vmin.f32 %v665_v47, %v697_v61  ;;  %v694_v8 = vmax.f32 %v660_v40, %v1078_v48  ;;  %v695_v9 = vmax.f32 %v661_v41, %v1079_v49  ;;  %v1086_v48 = vld [vmem:[%s1366_s29 + $0x290] sm:$0xff]  ;;  %v1087_v49 = vld [vmem:[%s1366_s29 + $0x298] sm:$0xff] }
  0xa7   : > { %v687_v6 = vmin.f32 %v651_v50, %v683_v0  ;;  %v688_v7 = vmin.f32 %v652_v51, %v684_v1  ;;  %v681_v12 = vmax.f32 %v647_v44, %v679_v56  ;;  %v682_v13 = vmax.f32 %v648_v45, %v680_v57 }
  0xa8   : > { %v698_v14 = vmax.f32 %v664_v46, %v696_v60  ;;  %v699_v15 = vmax.f32 %v665_v47, %v697_v61  ;;  %v685_v18 = vmax.f32 %v651_v50, %v683_v0  ;;  %v686_v19 = vmax.f32 %v652_v51, %v684_v1 }
  0xa9   : > { %v704_v20 = vmin.f32 %v668_v54, %v700_v4  ;;  %v705_v21 = vmin.f32 %v669_v55, %v701_v5  ;;  %v702_v22 = vmax.f32 %v668_v54, %v700_v4  ;;  %v703_v23 = vmax.f32 %v669_v55, %v701_v5 }
  0xaa   : > { %v713_v24 = vmin.f32 %v677_v62, %v1080_v10  ;;  %v714_v25 = vmin.f32 %v678_v63, %v1081_v11  ;;  %v689_v26 = vmax.f32 %v655_v58, %v687_v6  ;;  %v690_v27 = vmax.f32 %v656_v59, %v688_v7 }
  0xab   : > { %v730_v28 = vmin.f32 %v694_v8, %v1082_v16  ;;  %v731_v29 = vmin.f32 %v695_v9, %v1083_v17  ;;  %v711_v30 = vmax.f32 %v677_v62, %v1080_v10  ;;  %v712_v31 = vmax.f32 %v678_v63, %v1081_v11  ;;  %v1088_v10 = vld [vmem:[%s1366_s29 + $0x2a0] sm:$0xff]  ;;  %v1089_v11 = vld [vmem:[%s1366_s29 + $0x2a8] sm:$0xff] }
  0xac   : > { %v717_v32 = vmin.f32 %v681_v12, %v713_v24  ;;  %v718_v33 = vmin.f32 %v682_v13, %v714_v25  ;;  %v706_v34 = vmax.f32 %v672_v2, %v704_v20  ;;  %v707_v35 = vmax.f32 %v673_v3, %v705_v21 }
  0xad   : > { %v734_v36 = vmin.f32 %v698_v14, %v730_v28  ;;  %v735_v37 = vmin.f32 %v699_v15, %v731_v29  ;;  %v728_v40 = vmax.f32 %v694_v8, %v1082_v16  ;;  %v729_v41 = vmax.f32 %v695_v9, %v1083_v17  ;;  %v1090_v16 = vld [vmem:[%s1366_s29 + $0x2b0] sm:$0xff]  ;;  %v1091_v17 = vld [vmem:[%s1366_s29 + $0x2b8] sm:$0xff] }
  0xae   : > { %v721_v38 = vmin.f32 %v685_v18, %v717_v32  ;;  %v722_v39 = vmin.f32 %v686_v19, %v718_v33  ;;  %v715_v44 = vmax.f32 %v681_v12, %v713_v24  ;;  %v716_v45 = vmax.f32 %v682_v13, %v714_v25 }
  0xaf   : > { %v732_v46 = vmax.f32 %v698_v14, %v730_v28  ;;  %v733_v47 = vmax.f32 %v699_v15, %v731_v29  ;;  %v719_v50 = vmax.f32 %v685_v18, %v717_v32  ;;  %v720_v51 = vmax.f32 %v686_v19, %v718_v33 }
  0xb0   : > { %v738_v52 = vmin.f32 %v702_v22, %v734_v36  ;;  %v739_v53 = vmin.f32 %v703_v23, %v735_v37  ;;  %v736_v54 = vmax.f32 %v702_v22, %v734_v36  ;;  %v737_v55 = vmax.f32 %v703_v23, %v735_v37 }
  0xb1   : > { %v747_v56 = vmin.f32 %v711_v30, %v1084_v42  ;;  %v748_v57 = vmin.f32 %v712_v31, %v1085_v43  ;;  %v723_v58 = vmax.f32 %v689_v26, %v721_v38  ;;  %v724_v59 = vmax.f32 %v690_v27, %v722_v39 }
  0xb2   : > { %v764_v60 = vmin.f32 %v728_v40, %v1086_v48  ;;  %v765_v61 = vmin.f32 %v729_v41, %v1087_v49  ;;  %v745_v62 = vmax.f32 %v711_v30, %v1084_v42  ;;  %v746_v63 = vmax.f32 %v712_v31, %v1085_v43  ;;  %v1092_v42 = vld [vmem:[%s1366_s29 + $0x2c0] sm:$0xff]  ;;  %v1093_v43 = vld [vmem:[%s1366_s29 + $0x2c8] sm:$0xff] }
  0xb3   : > { %v751_v0 = vmin.f32 %v715_v44, %v747_v56  ;;  %v752_v1 = vmin.f32 %v716_v45, %v748_v57  ;;  %v740_v2 = vmax.f32 %v706_v34, %v738_v52  ;;  %v741_v3 = vmax.f32 %v707_v35, %v739_v53 }
  0xb4   : > { %v768_v4 = vmin.f32 %v732_v46, %v764_v60  ;;  %v769_v5 = vmin.f32 %v733_v47, %v765_v61  ;;  %v762_v8 = vmax.f32 %v728_v40, %v1086_v48  ;;  %v763_v9 = vmax.f32 %v729_v41, %v1087_v49  ;;  %v1094_v48 = vld [vmem:[%s1366_s29 + $0x2d0] sm:$0xff]  ;;  %v1095_v49 = vld [vmem:[%s1366_s29 + $0x2d8] sm:$0xff] }
  0xb5   : > { %v755_v6 = vmin.f32 %v719_v50, %v751_v0  ;;  %v756_v7 = vmin.f32 %v720_v51, %v752_v1  ;;  %v749_v12 = vmax.f32 %v715_v44, %v747_v56  ;;  %v750_v13 = vmax.f32 %v716_v45, %v748_v57 }
  0xb6   : > { %v766_v14 = vmax.f32 %v732_v46, %v764_v60  ;;  %v767_v15 = vmax.f32 %v733_v47, %v765_v61  ;;  %v753_v18 = vmax.f32 %v719_v50, %v751_v0  ;;  %v754_v19 = vmax.f32 %v720_v51, %v752_v1 }
  0xb7   : > { %v772_v20 = vmin.f32 %v736_v54, %v768_v4  ;;  %v773_v21 = vmin.f32 %v737_v55, %v769_v5  ;;  %v770_v22 = vmax.f32 %v736_v54, %v768_v4  ;;  %v771_v23 = vmax.f32 %v737_v55, %v769_v5 }
  0xb8   : > { %v781_v24 = vmin.f32 %v745_v62, %v1088_v10  ;;  %v782_v25 = vmin.f32 %v746_v63, %v1089_v11  ;;  %v757_v26 = vmax.f32 %v723_v58, %v755_v6  ;;  %v758_v27 = vmax.f32 %v724_v59, %v756_v7 }
  0xb9   : > { %v798_v28 = vmin.f32 %v762_v8, %v1090_v16  ;;  %v799_v29 = vmin.f32 %v763_v9, %v1091_v17  ;;  %v779_v30 = vmax.f32 %v745_v62, %v1088_v10  ;;  %v780_v31 = vmax.f32 %v746_v63, %v1089_v11  ;;  %v1096_v10 = vld [vmem:[%s1366_s29 + $0x2e0] sm:$0xff]  ;;  %v1097_v11 = vld [vmem:[%s1366_s29 + $0x2e8] sm:$0xff] }
  0xba   : > { %v785_v32 = vmin.f32 %v749_v12, %v781_v24  ;;  %v786_v33 = vmin.f32 %v750_v13, %v782_v25  ;;  %v774_v34 = vmax.f32 %v740_v2, %v772_v20  ;;  %v775_v35 = vmax.f32 %v741_v3, %v773_v21 }
  0xbb   : > { %v802_v36 = vmin.f32 %v766_v14, %v798_v28  ;;  %v803_v37 = vmin.f32 %v767_v15, %v799_v29  ;;  %v796_v40 = vmax.f32 %v762_v8, %v1090_v16  ;;  %v797_v41 = vmax.f32 %v763_v9, %v1091_v17  ;;  %v1507_v16 = vld [vmem:[%s1366_s29 + $0x2f0] sm:$0xff]  ;;  %v1510_v17 = vld [vmem:[%s1366_s29 + $0x2f8] sm:$0xff] }
  0xbc   : > { %v789_v38 = vmin.f32 %v753_v18, %v785_v32  ;;  %v790_v39 = vmin.f32 %v754_v19, %v786_v33  ;;  %v783_v44 = vmax.f32 %v749_v12, %v781_v24  ;;  %v784_v45 = vmax.f32 %v750_v13, %v782_v25 }
  0xbd   : > { %v800_v46 = vmax.f32 %v766_v14, %v798_v28  ;;  %v801_v47 = vmax.f32 %v767_v15, %v799_v29  ;;  %v787_v50 = vmax.f32 %v753_v18, %v785_v32  ;;  %v788_v51 = vmax.f32 %v754_v19, %v786_v33 }
  0xbe   : > { %v806_v52 = vmin.f32 %v770_v22, %v802_v36  ;;  %v807_v53 = vmin.f32 %v771_v23, %v803_v37  ;;  %v804_v54 = vmax.f32 %v770_v22, %v802_v36  ;;  %v805_v55 = vmax.f32 %v771_v23, %v803_v37 }
  0xbf   : > { %v815_v56 = vmin.f32 %v779_v30, %v1092_v42  ;;  %v816_v57 = vmin.f32 %v780_v31, %v1093_v43  ;;  %v791_v58 = vmax.f32 %v757_v26, %v789_v38  ;;  %v792_v59 = vmax.f32 %v758_v27, %v790_v39 }
  0xc0   : > { %v832_v60 = vmin.f32 %v796_v40, %v1094_v48  ;;  %v833_v61 = vmin.f32 %v797_v41, %v1095_v49  ;;  %v813_v62 = vmax.f32 %v779_v30, %v1092_v42  ;;  %v814_v63 = vmax.f32 %v780_v31, %v1093_v43  ;;  %v1100_v42 = vld [vmem:[%s1366_s29 + $0x300] sm:$0xff]  ;;  %v1101_v43 = vld [vmem:[%s1366_s29 + $0x308] sm:$0xff] }
  0xc1   : > { %v819_v0 = vmin.f32 %v783_v44, %v815_v56  ;;  %v820_v1 = vmin.f32 %v784_v45, %v816_v57  ;;  %v808_v2 = vmax.f32 %v774_v34, %v806_v52  ;;  %v809_v3 = vmax.f32 %v775_v35, %v807_v53 }
  0xc2   : > { %v836_v4 = vmin.f32 %v800_v46, %v832_v60  ;;  %v837_v5 = vmin.f32 %v801_v47, %v833_v61  ;;  %v1496_v8 = vmax.f32 %v796_v40, %v1094_v48  ;;  %v1498_v9 = vmax.f32 %v797_v41, %v1095_v49 }
  0xc3   : > { %v823_v6 = vmin.f32 %v787_v50, %v819_v0  ;;  %v824_v7 = vmin.f32 %v788_v51, %v820_v1  ;;  %v817_v12 = vmax.f32 %v783_v44, %v815_v56  ;;  %v818_v13 = vmax.f32 %v784_v45, %v816_v57 }
  0xc4   : > { %v1502_v14 = vmax.f32 %v800_v46, %v832_v60  ;;  %v1504_v15 = vmax.f32 %v801_v47, %v833_v61  ;;  %v821_v18 = vmax.f32 %v787_v50, %v819_v0  ;;  %v822_v19 = vmax.f32 %v788_v51, %v820_v1 }
  0xc5   : > { %v840_v20 = vmin.f32 %v804_v54, %v836_v4  ;;  %v841_v21 = vmin.f32 %v805_v55, %v837_v5  ;;  %v838_v22 = vmax.f32 %v804_v54, %v836_v4  ;;  %v839_v23 = vmax.f32 %v805_v55, %v837_v5 }
  0xc6   : > { %v849_v24 = vmin.f32 %v813_v62, %v1096_v10  ;;  %v850_v25 = vmin.f32 %v814_v63, %v1097_v11  ;;  %v825_v26 = vmax.f32 %v791_v58, %v823_v6  ;;  %v826_v27 = vmax.f32 %v792_v59, %v824_v7 }
  0xc7   : > { %v866_v28 = vmin.f32 %v1496_v8, %v1507_v16  ;;  %v867_v29 = vmin.f32 %v1498_v9, %v1510_v17  ;;  %v847_v30 = vmax.f32 %v813_v62, %v1096_v10  ;;  %v848_v31 = vmax.f32 %v814_v63, %v1097_v11 }
  0xc8   : > { %v853_v32 = vmin.f32 %v817_v12, %v849_v24  ;;  %v854_v33 = vmin.f32 %v818_v13, %v850_v25  ;;  %v842_v34 = vmax.f32 %v808_v2, %v840_v20  ;;  %v843_v35 = vmax.f32 %v809_v3, %v841_v21 }
  0xc9   : > { %v870_v36 = vmin.f32 %v1502_v14, %v866_v28  ;;  %v871_v37 = vmin.f32 %v1504_v15, %v867_v29  ;;  %v851_v38 = vmax.f32 %v817_v12, %v849_v24  ;;  %v852_v39 = vmax.f32 %v818_v13, %v850_v25 }
  0xca   : > { %v857_v40 = vmin.f32 %v821_v18, %v853_v32  ;;  %v858_v41 = vmin.f32 %v822_v19, %v854_v33  ;;  %v868_v44 = vmax.f32 %v1502_v14, %v866_v28  ;;  %v869_v45 = vmax.f32 %v1504_v15, %v867_v29 }
  0xcb   : > { %v874_v46 = vmin.f32 %v838_v22, %v870_v36  ;;  %v875_v47 = vmin.f32 %v839_v23, %v871_v37  ;;  %v855_v48 = vmax.f32 %v821_v18, %v853_v32  ;;  %v856_v49 = vmax.f32 %v822_v19, %v854_v33 }
  0xcc   : > { %v881_v50 = vmax.f32 %v847_v30, %v1100_v42  ;;  %v882_v51 = vmax.f32 %v848_v31, %v1101_v43  ;;  %v883_v54 = vmin.f32 %v847_v30, %v1100_v42  ;;  %v884_v55 = vmin.f32 %v848_v31, %v1101_v43 }
  0xcd   : > { %v876_v52 = vmax.f32 %v842_v34, %v874_v46  ;;  %v877_v53 = vmax.f32 %v843_v35, %v875_v47  ;;  %v859_v56 = vmax.f32 %v825_v26, %v857_v40  ;;  %v860_v57 = vmax.f32 %v826_v27, %v858_v41 }
  0xce   : > { %v872_v58 = vmax.f32 %v838_v22, %v870_v36  ;;  %v873_v59 = vmax.f32 %v839_v23, %v871_v37  ;;  %v885_v60 = vmax.f32 %v851_v38, %v883_v54  ;;  %v886_v61 = vmax.f32 %v852_v39, %v884_v55 }
  0xcf   : > { %v887_v62 = vmin.f32 %v851_v38, %v883_v54  ;;  %v888_v63 = vmin.f32 %v852_v39, %v884_v55  ;;  %v864_v0 = vmax.f32 %v1496_v8, %v1507_v16  ;;  %v865_v1 = vmax.f32 %v1498_v9, %v1510_v17 }
  0xd0   : > { %v895_v2 = vmax.f32 %v881_v50, %v876_v52  ;;  %v896_v3 = vmax.f32 %v882_v51, %v877_v53  ;;  %v897_v10 = vmax.f32 %v885_v60, %v872_v58  ;;  %v898_v11 = vmax.f32 %v886_v61, %v873_v59 }
  0xd1   : > { %v889_v4 = vmax.f32 %v855_v48, %v887_v62  ;;  %v890_v5 = vmax.f32 %v856_v49, %v888_v63  ;;  %v891_v6 = vmin.f32 %v855_v48, %v887_v62  ;;  %v892_v7 = vmin.f32 %v856_v49, %v888_v63 }
  0xd2   : > { %v899_v18 = vadd.f32 %v897_v10, %v895_v2  ;;  %v900_v19 = vadd.f32 %v898_v11, %v896_v3 }
  0xd3   : > { %v893_v12 = vmax.f32 %v859_v56, %v891_v6  ;;  %v894_v13 = vmax.f32 %v860_v57, %v892_v7  ;;  %v901_v14 = vmax.f32 %v889_v4, %v868_v44  ;;  %v902_v15 = vmax.f32 %v890_v5, %v869_v45 }
  0xd5   : > { %v905_v8 = vmax.f32 %v893_v12, %v864_v0  ;;  %v906_v16 = vmax.f32 %v894_v13, %v865_v1  ;;  %v903_v20 = vadd.f32 %v901_v14, %v899_v18  ;;  %v904_v9 = vadd.f32 %v902_v15, %v900_v19 }
  0xd7   : > { %v907_v17 = vadd.f32 %v905_v8, %v903_v20  ;;  %v908_v21 = vadd.f32 %v906_v16, %v904_v9 }
  0xd9   : > { %v909_v22 = vmul.f32 0.25, %v907_v17  ;;  %v910_v23 = vmul.f32 0.25, %v908_v21 }
  0xdb   : > { %911 = vst [vmem:[%s134_s25] sm:$0xff] %v909_v22  ;;  %912 = vst [vmem:[%s134_s25 + $0x8] sm:$0xff] %v910_v23 }
  0xdc   : > { %1202 = shalt.err (!%p1199_p10)
}
  0xdd   : > { %s1203_s13 = scalar_lea.hbm %s1531_s2, 256  ;;  %s1207_s20 = scalar_lea.hbm %s1577_s1, 512 }
  0xde   : > { %p1204_p0 = scmp.ne.s32.totalorder %s1531_s2, %s1203_s13  ;;  %p1208_p1 = scmp.lt.s32.totalorder %s1531_s2, %s1577_s1 }
  0xdf   : > { %p1209_p3 = scmp.lt.s32.totalorder %s1207_s20, %s1203_s13 }
  0xe0   : > { %p1205_p2 = pnand %p1204_p0, %p1585_p12 }
  0xe1   : > { %p1210_p6 = por %p1209_p3, %p1208_p1 }
  0xe2   : > { %p1206_p9 = pneg %p1205_p2 }
  0xe4   : > { %p1211_p11 = pnand %p1210_p6, %p1206_p9 }
  0xe6   : > { %1214 = shalt.err (!%p1211_p11)
}
  0xe7   : > { %s1259_s26 = smov 128   ;;  %s1260_s29 = smov 8  }
  0xe8   : > { %1113 = dma.vmem_to_hbm [thread:$0]  (%p1585_p12), %s1533_s27, 256, %s1531_s2, %s914_s3, %s1259_s26, %s1259_s26, %s1260_s29  }
  0xe9 PF: > { %s942_s16 = sand.u32 1, %s1241_s6   ;;  %p1586_p13 = scmp.ne.s32.totalorder %s1582_s18, 0 }
  0xea   : > { %p1587_p4 = scmp.ge.s32.totalorder %s1253_s9, 2  ;;  %s943_s24 = scalar_lea.sflag [#allocation4], %s942_s16 }
  0xec   : > { %p1120_p5 = pnand %p1587_p4, %p1586_p13 }
  0xee   : > { %p1121_p7 = pneg %p1120_p5 }
  0xf0   : > { %1236 = dma.done.wait (%p1121_p7), %s943_s24, 256  }
  0xf1   : > { %1238 = vsyncadd (%p1121_p7), %s943_s24, 4294967040  ;;  %p14_p8 = scmp.ge.s32.totalorder %s1296_s12, 4   ;;  %s1588_s6 = smov %s1245_s7 }
  0xf2   : > { %s1589_s7 = smov %s1249_s8  ;;  %s1590_s8 = smov %s1308_s15 }
  0xf3   : > { %s1591_s9 = smov %s1296_s12  ;;  %16 = sbr.rel (!%p14_p8) target bundleno = 5 (0x5), region = 117 }
  0xf8   :  { %948 = vsyncpa [#allocation3], 1 }
  0xf9   :  { %950 = vsyncpa [#allocation3 + $0x1], 1 }
  0xfa   :  { %951 = vsyncpa [#allocation4], 1 }
  0xfb   :  { %953 = vsyncpa [#allocation4 + $0x1], 1 }

</bundles_post_ra>
